<compile_context>
chip_gen: v5e
topology: v5e:2x2
jax: 0.10.0
libtpu: 0.0.40
codegen_flags: <defaults>
</compile_context>

<pallas_src>
import math

import jax
import jax.numpy as jnp
from jax.experimental import pallas as pl
from jax.experimental.pallas import tpu as pltpu

# ----------------------------- model config (small) -----------------------------
VOCAB = 100
TYPE_VOCAB = 2
MAX_POS = 64
HIDDEN = 32
N_HEADS = 4
HEAD_DIM = HIDDEN // N_HEADS
INTERMEDIATE = 64
N_LAYERS = 2
NUM_LABELS = 5
BATCH = 2
SEQ = 8
LN_EPS = 1e-12
LANE = 128  # lane-dense padding width

# ---------------------- packed-slab row layout (static constants) ----------------
# bf16 weight slab: every weight lane-padded to 128 cols, row-stacked.
W_QKV0 = 0                                   # L blocks of HIDDEN rows, cols [0:3H)
W_O0 = W_QKV0 + N_LAYERS * HIDDEN            # L blocks of HIDDEN rows, cols [0:H)
W_I0 = W_O0 + N_LAYERS * HIDDEN              # L blocks of HIDDEN rows, cols [0:I)
W_F0 = W_I0 + N_LAYERS * HIDDEN              # L blocks of INTERMEDIATE rows, cols [0:H)
W_CLS0 = W_F0 + N_LAYERS * INTERMEDIATE      # HIDDEN rows, cols [0:128) (zero-padded)
W_ROWS = W_CLS0 + HIDDEN

# f32 slab: one 128-wide row per LN gamma/beta/bias vector.
F_EMB_G = 0
F_EMB_B = 1
F_LAYER0 = 2
F_PER_LAYER = 8          # bqkv, bo, ln1_g, ln1_b, bi, bf, ln2_g, ln2_b
F_CLS_B = F_LAYER0 + N_LAYERS * F_PER_LAYER
F_ROWS = F_CLS_B + 1


# ------------------------------ in-kernel helpers --------------------------------
def _layernorm(x, g, b):
    """LayerNorm over last dim in f32; x:(M,H), g/b:(1,H)."""
    mu = jnp.mean(x, axis=-1, keepdims=True)
    var = jnp.mean((x - mu) * (x - mu), axis=-1, keepdims=True)
    return (x - mu) * jax.lax.rsqrt(var + LN_EPS) * g + b


def _gelu(y):
    # TODO(synk): tanh-approx GELU; HF BERT uses erf-GELU (numerically very close).
    return 0.5 * y * (1.0 + jnp.tanh(0.7978845608028654 * (y + 0.044715 * y * y * y)))


def _mm(x_f32, w_bf16):
    """bf16 MXU matmul with f32 accumulation."""
    return jnp.dot(x_f32.astype(jnp.bfloat16), w_bf16,
                   preferred_element_type=jnp.float32)


# ------------------------------- fused Pallas kernel ------------------------------
def bert_fused_kernel(emb_ref, mask_ref, wslab_ref, fslab_ref, out_ref):
    """One grid step == one batch element (SEQ rows). Whole encoder stack fused."""

    def frow(r, width):
        return fslab_ref[r:r + 1, 0:width]          # (1, width) f32

    add_mask = mask_ref[0]                          # (1, S) additive key-axis mask

    # Embedding LayerNorm (embeddings arrive pre-summed from the wrapper gathers).
    h = _layernorm(emb_ref[...].astype(jnp.float32),
                   frow(F_EMB_G, HIDDEN), frow(F_EMB_B, HIDDEN))      # (S, H) f32

    for l in range(N_LAYERS):                       # static unroll (2 layers)
        fb = F_LAYER0 + l * F_PER_LAYER
        wqkv = wslab_ref[W_QKV0 + l * HIDDEN:W_QKV0 + (l + 1) * HIDDEN, 0:3 * HIDDEN]
        wo = wslab_ref[W_O0 + l * HIDDEN:W_O0 + (l + 1) * HIDDEN, 0:HIDDEN]
        wi = wslab_ref[W_I0 + l * HIDDEN:W_I0 + (l + 1) * HIDDEN, 0:INTERMEDIATE]
        wf = wslab_ref[W_F0 + l * INTERMEDIATE:W_F0 + (l + 1) * INTERMEDIATE, 0:HIDDEN]

        # ---- packed QKV projection (scale already folded into the Q columns) ----
        qkv = _mm(h, wqkv) + frow(fb + 0, 3 * HIDDEN)                 # (S, 3H) f32
        qkv_b = qkv.astype(jnp.bfloat16)

        def heads(off):                              # (N_HEADS, S, HEAD_DIM) bf16
            return jnp.stack(
                [qkv_b[:, off + hh * HEAD_DIM:off + (hh + 1) * HEAD_DIM]
                 for hh in range(N_HEADS)], axis=0)

        q, k, v = heads(0), heads(HIDDEN), heads(2 * HIDDEN)

        # ---- attention: batched over heads, everything in registers ----
        s = jnp.einsum('hqd,hkd->hqk', q, k,
                       preferred_element_type=jnp.float32)            # (NH, S, S)
        s = s + add_mask                                              # mask key axis
        s = s - jnp.max(s, axis=-1, keepdims=True)
        p = jnp.exp(s)
        p = p * pl.reciprocal(jnp.sum(p, axis=-1, keepdims=True))
        ctx = jnp.einsum('hqk,hkd->hqd', p.astype(jnp.bfloat16), v,
                         preferred_element_type=jnp.float32)          # (NH, S, dh)
        ctx = jnp.concatenate([ctx[hh] for hh in range(N_HEADS)], axis=-1)  # (S, H)

        # ---- output projection + residual + LN1 ----
        attn_out = _mm(ctx, wo) + frow(fb + 1, HIDDEN)
        h1 = _layernorm(attn_out + h, frow(fb + 2, HIDDEN), frow(fb + 3, HIDDEN))

        # ---- FFN (GELU) + residual + LN2 ----
        inter = _gelu(_mm(h1, wi) + frow(fb + 4, INTERMEDIATE))
        ffn = _mm(inter, wf) + frow(fb + 5, HIDDEN)
        h = _layernorm(ffn + h1, frow(fb + 6, HIDDEN), frow(fb + 7, HIDDEN))

    # ---- classifier head, lane-dense 128-wide (zero-padded) output ----
    logits = _mm(h, wslab_ref[W_CLS0:W_CLS0 + HIDDEN, :]) + frow(F_CLS_B, LANE)
    out_ref[...] = logits.astype(out_ref.dtype)


# ------------------------------ parameter init -----------------------------------
def init_params(key):
    keys = jax.random.split(key, 8)
    L = N_LAYERS
    scale = 1.0 / math.sqrt(HEAD_DIM)

    def nrm(k, shape):
        return 0.02 * jax.random.normal(k, shape, jnp.float32)

    def pad128(x):
        return jnp.pad(x, [(0, 0)] * (x.ndim - 1) + [(0, LANE - x.shape[-1])])

    # raw matmul weights (f32), Q-scale folded, then packed into one bf16 slab
    wqkv = nrm(keys[3], (L, HIDDEN, 3 * HIDDEN))
    wqkv = wqkv.at[:, :, :HIDDEN].multiply(scale)        # fold 1/sqrt(dh) into Q
    wo = nrm(keys[4], (L, HIDDEN, HIDDEN))
    wi = nrm(keys[5], (L, HIDDEN, INTERMEDIATE))
    wf = nrm(keys[6], (L, INTERMEDIATE, HIDDEN))
    cls_w = nrm(keys[7], (HIDDEN, NUM_LABELS))

    wslab = jnp.concatenate(
        [pad128(wqkv).reshape(L * HIDDEN, LANE),
         pad128(wo).reshape(L * HIDDEN, LANE),
         pad128(wi).reshape(L * HIDDEN, LANE),
         pad128(wf).reshape(L * INTERMEDIATE, LANE),
         pad128(cls_w)],
        axis=0).astype(jnp.bfloat16)
    assert wslab.shape == (W_ROWS, LANE)

    # f32 slab: LN gammas/betas and biases, one lane-padded row each
    def row(vec):
        return pad128(vec.reshape(1, -1))

    f_rows = [row(jnp.ones(HIDDEN, jnp.float32)),        # emb LN gamma
              row(jnp.zeros(HIDDEN, jnp.float32))]       # emb LN beta
    for _ in range(L):
        f_rows += [row(jnp.zeros(3 * HIDDEN, jnp.float32)),    # bqkv (Q part scaled)
                   row(jnp.zeros(HIDDEN, jnp.float32)),        # bo
                   row(jnp.ones(HIDDEN, jnp.float32)),         # ln1 gamma
                   row(jnp.zeros(HIDDEN, jnp.float32)),        # ln1 beta
                   row(jnp.zeros(INTERMEDIATE, jnp.float32)),  # bi
                   row(jnp.zeros(HIDDEN, jnp.float32)),        # bf
                   row(jnp.ones(HIDDEN, jnp.float32)),         # ln2 gamma
                   row(jnp.zeros(HIDDEN, jnp.float32))]        # ln2 beta
    f_rows.append(row(jnp.zeros(NUM_LABELS, jnp.float32)))     # cls bias (padded)
    fslab = jnp.concatenate(f_rows, axis=0).astype(jnp.float32)
    assert fslab.shape == (F_ROWS, LANE)

    return {
        "word_emb": nrm(keys[0], (VOCAB, HIDDEN)),
        "pos_emb": nrm(keys[1], (MAX_POS, HIDDEN)),
        "type_emb": nrm(keys[2], (TYPE_VOCAB, HIDDEN)),
        "wslab": wslab,
        "fslab": fslab,
    }


# ------------------------------- forward pass -------------------------------------
def bert_crf_forward(params, input_ids, token_type_ids, attention_mask):
    B, S = input_ids.shape
    positions = jnp.arange(S, dtype=jnp.int32)

    # Embedding gathers stay in plain JAX (glue); everything else is one kernel.
    emb = (params["word_emb"][input_ids]
           + params["pos_emb"][positions][None, :, :]
           + params["type_emb"][token_type_ids]).reshape(B * S, HIDDEN)

    # BERT-style extended additive mask: (B, 1, S) with -10000 on padding.
    add_mask = ((1.0 - attention_mask.astype(jnp.float32)) * -10000.0)[:, None, :]

    padded_logits = pl.pallas_call(
        bert_fused_kernel,
        out_shape=jax.ShapeDtypeStruct((B * SEQ, LANE), jnp.float32),
        grid=(B,),
        in_specs=[
            pl.BlockSpec((SEQ, HIDDEN), lambda b: (b, 0)),       # per-batch rows
            pl.BlockSpec((1, 1, SEQ), lambda b: (b, 0, 0)),      # per-batch mask
            pl.BlockSpec((W_ROWS, LANE), lambda b: (0, 0)),      # bf16 weight slab
            pl.BlockSpec((F_ROWS, LANE), lambda b: (0, 0)),      # f32 LN/bias slab
        ],
        out_specs=pl.BlockSpec((SEQ, LANE), lambda b: (b, 0)),
        compiler_params=pltpu.CompilerParams(
            dimension_semantics=("parallel",),   # second TC on v7x
        ),
    )(emb, add_mask, params["wslab"], params["fslab"])

    return padded_logits[:, :NUM_LABELS].reshape(B, S, NUM_LABELS)


# TODO(synk): CRF.negative_log_loss / get_batch_best_path belong to loss_fn/predict,
# not Bert_CRF.forward (which only returns BERT logits), so they are not kernelized.


if __name__ == "__main__":
    key = jax.random.PRNGKey(0)
    pkey, ik, tk, mk = jax.random.split(key, 4)
    params = init_params(pkey)

    input_ids = jax.random.randint(ik, (BATCH, SEQ), 0, VOCAB, dtype=jnp.int32)
    token_type_ids = jax.random.randint(tk, (BATCH, SEQ), 0, TYPE_VOCAB, dtype=jnp.int32)
    attention_mask = jnp.ones((BATCH, SEQ), jnp.int32).at[:, SEQ - 2:].set(0)

    logits = jax.jit(bert_crf_forward)(params, input_ids, token_type_ids, attention_mask)
    jax.block_until_ready(logits)
    assert logits.shape == (BATCH, SEQ, NUM_LABELS)
    assert bool(jnp.all(jnp.isfinite(logits)))
    print("KERNEL_OK")
</pallas_src>

<mosaic_0001>
module attributes {stable_mosaic.version = 11 : i64} {
  func.func @bert_fused_kernel(%arg0: i32, %arg1: memref<8x32xf32, #tpu.memory_space<vmem>>, %arg2: memref<1x1x8xf32, #tpu.memory_space<vmem>>, %arg3: memref<352x128xbf16, #tpu.memory_space<vmem>>, %arg4: memref<19x128xf32, #tpu.memory_space<vmem>>, %arg5: memref<8x128xf32, #tpu.memory_space<vmem>>) attributes {dimension_semantics = [#tpu.dimension_semantics<parallel>], iteration_bounds = array<i64: 2>, scalar_prefetch = 0 : i64, scratch_operands = 0 : i64, tpu.core_type = #tpu.core_type<tc>, window_params = [{transform_indices = @transform_0, window_bounds = array<i64: 8, 32>}, {transform_indices = @transform_1, window_bounds = array<i64: 1, 1, 8>}, {pipeline_mode = #tpu.pipeline_mode<synchronous>, transform_indices = @transform_2, window_bounds = array<i64: 352, 128>}, {pipeline_mode = #tpu.pipeline_mode<synchronous>, transform_indices = @transform_3, window_bounds = array<i64: 19, 128>}, {transform_indices = @transform_4, window_bounds = array<i64: 8, 128>}]} {
    %c0 = arith.constant 0 : index
    %c0_0 = arith.constant 0 : index
    %c0_1 = arith.constant 0 : index
    %0 = vector.load %arg2[%c0, %c0_0, %c0_1] : memref<1x1x8xf32, #tpu.memory_space<vmem>>, vector<1x1x8xf32>
    %1 = vector.shape_cast %0 : vector<1x1x8xf32> to vector<1x8xf32>
    %c0_2 = arith.constant 0 : index
    %c0_3 = arith.constant 0 : index
    %2 = vector.load %arg1[%c0_2, %c0_3] : memref<8x32xf32, #tpu.memory_space<vmem>>, vector<8x32xf32>
    %c0_4 = arith.constant 0 : index
    %c0_5 = arith.constant 0 : index
    %3 = vector.load %arg4[%c0_4, %c0_5] : memref<19x128xf32, #tpu.memory_space<vmem>>, vector<1x32xf32>
    %c1 = arith.constant 1 : index
    %c0_6 = arith.constant 0 : index
    %4 = vector.load %arg4[%c1, %c0_6] : memref<19x128xf32, #tpu.memory_space<vmem>>, vector<1x32xf32>
    %cst = arith.constant dense<0.000000e+00> : vector<8xf32>
    %5 = vector.multi_reduction <add>, %2, %cst [1] : vector<8x32xf32> to vector<8xf32>
    %6 = vector.shape_cast %5 : vector<8xf32> to vector<8x1xf32>
    %cst_7 = arith.constant 3.200000e+01 : f32
    %7 = vector.broadcast %cst_7 : f32 to vector<8x1xf32>
    %8 = arith.divf %6, %7 : vector<8x1xf32>
    %9 = vector.broadcast %8 : vector<8x1xf32> to vector<8x32xf32>
    %10 = arith.subf %2, %9 : vector<8x32xf32>
    %11 = vector.broadcast %8 : vector<8x1xf32> to vector<8x32xf32>
    %12 = arith.subf %2, %11 : vector<8x32xf32>
    %13 = arith.mulf %10, %12 : vector<8x32xf32>
    %cst_8 = arith.constant dense<0.000000e+00> : vector<8xf32>
    %14 = vector.multi_reduction <add>, %13, %cst_8 [1] : vector<8x32xf32> to vector<8xf32>
    %15 = vector.shape_cast %14 : vector<8xf32> to vector<8x1xf32>
    %cst_9 = arith.constant 3.200000e+01 : f32
    %16 = vector.broadcast %cst_9 : f32 to vector<8x1xf32>
    %17 = arith.divf %15, %16 : vector<8x1xf32>
    %18 = vector.broadcast %8 : vector<8x1xf32> to vector<8x32xf32>
    %19 = arith.subf %2, %18 : vector<8x32xf32>
    %cst_10 = arith.constant 9.99999996E-13 : f32
    %20 = vector.broadcast %cst_10 : f32 to vector<8x1xf32>
    %21 = arith.addf %17, %20 : vector<8x1xf32>
    %22 = math.rsqrt %21 : vector<8x1xf32>
    %23 = vector.broadcast %22 : vector<8x1xf32> to vector<8x32xf32>
    %24 = arith.mulf %19, %23 : vector<8x32xf32>
    %25 = vector.broadcast %3 : vector<1x32xf32> to vector<8x32xf32>
    %26 = arith.mulf %24, %25 : vector<8x32xf32>
    %27 = vector.broadcast %4 : vector<1x32xf32> to vector<8x32xf32>
    %28 = arith.addf %26, %27 : vector<8x32xf32>
    %c0_11 = arith.constant 0 : index
    %c0_12 = arith.constant 0 : index
    %29 = vector.load %arg3[%c0_11, %c0_12] : memref<352x128xbf16, #tpu.memory_space<vmem>>, vector<32x96xbf16>
    %c64 = arith.constant 64 : index
    %c0_13 = arith.constant 0 : index
    %30 = vector.load %arg3[%c64, %c0_13] : memref<352x128xbf16, #tpu.memory_space<vmem>>, vector<32x32xbf16>
    %c128 = arith.constant 128 : index
    %c0_14 = arith.constant 0 : index
    %31 = vector.load %arg3[%c128, %c0_14] : memref<352x128xbf16, #tpu.memory_space<vmem>>, vector<32x64xbf16>
    %c192 = arith.constant 192 : index
    %c0_15 = arith.constant 0 : index
    %32 = vector.load %arg3[%c192, %c0_15] : memref<352x128xbf16, #tpu.memory_space<vmem>>, vector<64x32xbf16>
    %33 = arith.truncf %28 : vector<8x32xf32> to vector<8x32xbf16>
    %cst_16 = arith.constant dense<0.000000e+00> : vector<8x96xf32>
    %34 = tpu.matmul %33, %29, %cst_16 {dimension_numbers = #tpu.dot_dimension_numbers<[1], [0], [0], [1], [0, 0, 1, 1], [], []>} : vector<8x32xbf16>, vector<32x96xbf16>, vector<8x96xf32> -> vector<8x96xf32>
    %c2 = arith.constant 2 : index
    %c0_17 = arith.constant 0 : index
    %35 = vector.load %arg4[%c2, %c0_17] : memref<19x128xf32, #tpu.memory_space<vmem>>, vector<1x96xf32>
    %36 = vector.broadcast %35 : vector<1x96xf32> to vector<8x96xf32>
    %37 = arith.addf %34, %36 : vector<8x96xf32>
    %38 = arith.truncf %37 : vector<8x96xf32> to vector<8x96xbf16>
    %39 = vector.extract_strided_slice %38 {offsets = [0, 0], sizes = [8, 8], strides = [1, 1]} : vector<8x96xbf16> to vector<8x8xbf16>
    %40 = vector.extract_strided_slice %38 {offsets = [0, 8], sizes = [8, 8], strides = [1, 1]} : vector<8x96xbf16> to vector<8x8xbf16>
    %41 = vector.extract_strided_slice %38 {offsets = [0, 16], sizes = [8, 8], strides = [1, 1]} : vector<8x96xbf16> to vector<8x8xbf16>
    %42 = vector.extract_strided_slice %38 {offsets = [0, 24], sizes = [8, 8], strides = [1, 1]} : vector<8x96xbf16> to vector<8x8xbf16>
    %43 = vector.shape_cast %39 : vector<8x8xbf16> to vector<1x8x8xbf16>
    %44 = vector.shape_cast %40 : vector<8x8xbf16> to vector<1x8x8xbf16>
    %45 = vector.shape_cast %41 : vector<8x8xbf16> to vector<1x8x8xbf16>
    %46 = vector.shape_cast %42 : vector<8x8xbf16> to vector<1x8x8xbf16>
    %47 = tpu.concatenate %43, %44, %45, %46 in 0 : vector<1x8x8xbf16>, vector<1x8x8xbf16>, vector<1x8x8xbf16>, vector<1x8x8xbf16> -> vector<4x8x8xbf16>
    %48 = vector.extract_strided_slice %38 {offsets = [0, 32], sizes = [8, 8], strides = [1, 1]} : vector<8x96xbf16> to vector<8x8xbf16>
    %49 = vector.extract_strided_slice %38 {offsets = [0, 40], sizes = [8, 8], strides = [1, 1]} : vector<8x96xbf16> to vector<8x8xbf16>
    %50 = vector.extract_strided_slice %38 {offsets = [0, 48], sizes = [8, 8], strides = [1, 1]} : vector<8x96xbf16> to vector<8x8xbf16>
    %51 = vector.extract_strided_slice %38 {offsets = [0, 56], sizes = [8, 8], strides = [1, 1]} : vector<8x96xbf16> to vector<8x8xbf16>
    %52 = vector.shape_cast %48 : vector<8x8xbf16> to vector<1x8x8xbf16>
    %53 = vector.shape_cast %49 : vector<8x8xbf16> to vector<1x8x8xbf16>
    %54 = vector.shape_cast %50 : vector<8x8xbf16> to vector<1x8x8xbf16>
    %55 = vector.shape_cast %51 : vector<8x8xbf16> to vector<1x8x8xbf16>
    %56 = tpu.concatenate %52, %53, %54, %55 in 0 : vector<1x8x8xbf16>, vector<1x8x8xbf16>, vector<1x8x8xbf16>, vector<1x8x8xbf16> -> vector<4x8x8xbf16>
    %57 = vector.extract_strided_slice %38 {offsets = [0, 64], sizes = [8, 8], strides = [1, 1]} : vector<8x96xbf16> to vector<8x8xbf16>
    %58 = vector.extract_strided_slice %38 {offsets = [0, 72], sizes = [8, 8], strides = [1, 1]} : vector<8x96xbf16> to vector<8x8xbf16>
    %59 = vector.extract_strided_slice %38 {offsets = [0, 80], sizes = [8, 8], strides = [1, 1]} : vector<8x96xbf16> to vector<8x8xbf16>
    %60 = vector.extract_strided_slice %38 {offsets = [0, 88], sizes = [8, 8], strides = [1, 1]} : vector<8x96xbf16> to vector<8x8xbf16>
    %61 = vector.shape_cast %57 : vector<8x8xbf16> to vector<1x8x8xbf16>
    %62 = vector.shape_cast %58 : vector<8x8xbf16> to vector<1x8x8xbf16>
    %63 = vector.shape_cast %59 : vector<8x8xbf16> to vector<1x8x8xbf16>
    %64 = vector.shape_cast %60 : vector<8x8xbf16> to vector<1x8x8xbf16>
    %65 = tpu.concatenate %61, %62, %63, %64 in 0 : vector<1x8x8xbf16>, vector<1x8x8xbf16>, vector<1x8x8xbf16>, vector<1x8x8xbf16> -> vector<4x8x8xbf16>
    "tpu.trace_start"() <{level = 10 : i32, message = "hqd,hkd->hqk"}> : () -> ()
    %cst_18 = arith.constant dense<0.000000e+00> : vector<4x8x8xf32>
    %66 = tpu.matmul %47, %56, %cst_18 {dimension_numbers = #tpu.dot_dimension_numbers<[2], [2], [1], [1], [0, 0, 0, 1, 1, 1], [0], [0]>} : vector<4x8x8xbf16>, vector<4x8x8xbf16>, vector<4x8x8xf32> -> vector<4x8x8xf32>
    "tpu.trace_stop"() : () -> ()
    %67 = vector.shape_cast %1 : vector<1x8xf32> to vector<1x1x8xf32>
    %68 = vector.broadcast %67 : vector<1x1x8xf32> to vector<4x8x8xf32>
    %69 = arith.addf %66, %68 : vector<4x8x8xf32>
    %cst_19 = arith.constant dense<0xFF800000> : vector<4x8xf32>
    %70 = vector.multi_reduction <maximumf>, %69, %cst_19 [2] : vector<4x8x8xf32> to vector<4x8xf32>
    %71 = vector.shape_cast %70 : vector<4x8xf32> to vector<4x8x1xf32>
    %72 = vector.broadcast %71 : vector<4x8x1xf32> to vector<4x8x8xf32>
    %73 = arith.subf %69, %72 : vector<4x8x8xf32>
    %74 = math.exp %73 : vector<4x8x8xf32>
    %cst_20 = arith.constant dense<0.000000e+00> : vector<4x8xf32>
    %75 = vector.multi_reduction <add>, %74, %cst_20 [2] : vector<4x8x8xf32> to vector<4x8xf32>
    %76 = vector.shape_cast %75 : vector<4x8xf32> to vector<4x8x1xf32>
    %77 = tpu.reciprocal %76 : vector<4x8x1xf32> -> vector<4x8x1xf32>
    %78 = vector.broadcast %77 : vector<4x8x1xf32> to vector<4x8x8xf32>
    %79 = arith.mulf %74, %78 : vector<4x8x8xf32>
    %80 = arith.truncf %79 : vector<4x8x8xf32> to vector<4x8x8xbf16>
    "tpu.trace_start"() <{level = 10 : i32, message = "hqk,hkd->hqd"}> : () -> ()
    %cst_21 = arith.constant dense<0.000000e+00> : vector<4x8x8xf32>
    %81 = tpu.matmul %80, %65, %cst_21 {dimension_numbers = #tpu.dot_dimension_numbers<[2], [1], [1], [2], [0, 0, 0, 1, 1, 2], [0], [0]>} : vector<4x8x8xbf16>, vector<4x8x8xbf16>, vector<4x8x8xf32> -> vector<4x8x8xf32>
    "tpu.trace_stop"() : () -> ()
    %82 = vector.extract_strided_slice %81 {offsets = [0, 0, 0], sizes = [1, 8, 8], strides = [1, 1, 1]} : vector<4x8x8xf32> to vector<1x8x8xf32>
    %83 = vector.shape_cast %82 : vector<1x8x8xf32> to vector<8x8xf32>
    %84 = vector.extract_strided_slice %81 {offsets = [1, 0, 0], sizes = [1, 8, 8], strides = [1, 1, 1]} : vector<4x8x8xf32> to vector<1x8x8xf32>
    %85 = vector.shape_cast %84 : vector<1x8x8xf32> to vector<8x8xf32>
    %86 = vector.extract_strided_slice %81 {offsets = [2, 0, 0], sizes = [1, 8, 8], strides = [1, 1, 1]} : vector<4x8x8xf32> to vector<1x8x8xf32>
    %87 = vector.shape_cast %86 : vector<1x8x8xf32> to vector<8x8xf32>
    %88 = vector.extract_strided_slice %81 {offsets = [3, 0, 0], sizes = [1, 8, 8], strides = [1, 1, 1]} : vector<4x8x8xf32> to vector<1x8x8xf32>
    %89 = vector.shape_cast %88 : vector<1x8x8xf32> to vector<8x8xf32>
    %90 = tpu.concatenate %83, %85, %87, %89 in 1 : vector<8x8xf32>, vector<8x8xf32>, vector<8x8xf32>, vector<8x8xf32> -> vector<8x32xf32>
    %91 = arith.truncf %90 : vector<8x32xf32> to vector<8x32xbf16>
    %cst_22 = arith.constant dense<0.000000e+00> : vector<8x32xf32>
    %92 = tpu.matmul %91, %30, %cst_22 {dimension_numbers = #tpu.dot_dimension_numbers<[1], [0], [0], [1], [0, 0, 1, 1], [], []>} : vector<8x32xbf16>, vector<32x32xbf16>, vector<8x32xf32> -> vector<8x32xf32>
    %c3 = arith.constant 3 : index
    %c0_23 = arith.constant 0 : index
    %93 = vector.load %arg4[%c3, %c0_23] : memref<19x128xf32, #tpu.memory_space<vmem>>, vector<1x32xf32>
    %94 = vector.broadcast %93 : vector<1x32xf32> to vector<8x32xf32>
    %95 = arith.addf %92, %94 : vector<8x32xf32>
    %96 = arith.addf %95, %28 : vector<8x32xf32>
    %c4 = arith.constant 4 : index
    %c0_24 = arith.constant 0 : index
    %97 = vector.load %arg4[%c4, %c0_24] : memref<19x128xf32, #tpu.memory_space<vmem>>, vector<1x32xf32>
    %c5 = arith.constant 5 : index
    %c0_25 = arith.constant 0 : index
    %98 = vector.load %arg4[%c5, %c0_25] : memref<19x128xf32, #tpu.memory_space<vmem>>, vector<1x32xf32>
    %cst_26 = arith.constant dense<0.000000e+00> : vector<8xf32>
    %99 = vector.multi_reduction <add>, %96, %cst_26 [1] : vector<8x32xf32> to vector<8xf32>
    %100 = vector.shape_cast %99 : vector<8xf32> to vector<8x1xf32>
    %cst_27 = arith.constant 3.200000e+01 : f32
    %101 = vector.broadcast %cst_27 : f32 to vector<8x1xf32>
    %102 = arith.divf %100, %101 : vector<8x1xf32>
    %103 = vector.broadcast %102 : vector<8x1xf32> to vector<8x32xf32>
    %104 = arith.subf %96, %103 : vector<8x32xf32>
    %105 = vector.broadcast %102 : vector<8x1xf32> to vector<8x32xf32>
    %106 = arith.subf %96, %105 : vector<8x32xf32>
    %107 = arith.mulf %104, %106 : vector<8x32xf32>
    %cst_28 = arith.constant dense<0.000000e+00> : vector<8xf32>
    %108 = vector.multi_reduction <add>, %107, %cst_28 [1] : vector<8x32xf32> to vector<8xf32>
    %109 = vector.shape_cast %108 : vector<8xf32> to vector<8x1xf32>
    %cst_29 = arith.constant 3.200000e+01 : f32
    %110 = vector.broadcast %cst_29 : f32 to vector<8x1xf32>
    %111 = arith.divf %109, %110 : vector<8x1xf32>
    %112 = vector.broadcast %102 : vector<8x1xf32> to vector<8x32xf32>
    %113 = arith.subf %96, %112 : vector<8x32xf32>
    %cst_30 = arith.constant 9.99999996E-13 : f32
    %114 = vector.broadcast %cst_30 : f32 to vector<8x1xf32>
    %115 = arith.addf %111, %114 : vector<8x1xf32>
    %116 = math.rsqrt %115 : vector<8x1xf32>
    %117 = vector.broadcast %116 : vector<8x1xf32> to vector<8x32xf32>
    %118 = arith.mulf %113, %117 : vector<8x32xf32>
    %119 = vector.broadcast %97 : vector<1x32xf32> to vector<8x32xf32>
    %120 = arith.mulf %118, %119 : vector<8x32xf32>
    %121 = vector.broadcast %98 : vector<1x32xf32> to vector<8x32xf32>
    %122 = arith.addf %120, %121 : vector<8x32xf32>
    %123 = arith.truncf %122 : vector<8x32xf32> to vector<8x32xbf16>
    %cst_31 = arith.constant dense<0.000000e+00> : vector<8x64xf32>
    %124 = tpu.matmul %123, %31, %cst_31 {dimension_numbers = #tpu.dot_dimension_numbers<[1], [0], [0], [1], [0, 0, 1, 1], [], []>} : vector<8x32xbf16>, vector<32x64xbf16>, vector<8x64xf32> -> vector<8x64xf32>
    %c6 = arith.constant 6 : index
    %c0_32 = arith.constant 0 : index
    %125 = vector.load %arg4[%c6, %c0_32] : memref<19x128xf32, #tpu.memory_space<vmem>>, vector<1x64xf32>
    %126 = vector.broadcast %125 : vector<1x64xf32> to vector<8x64xf32>
    %127 = arith.addf %124, %126 : vector<8x64xf32>
    %cst_33 = arith.constant 5.000000e-01 : f32
    %128 = vector.broadcast %cst_33 : f32 to vector<8x64xf32>
    %129 = arith.mulf %128, %127 : vector<8x64xf32>
    %cst_34 = arith.constant 4.471500e-02 : f32
    %130 = vector.broadcast %cst_34 : f32 to vector<8x64xf32>
    %131 = arith.mulf %130, %127 : vector<8x64xf32>
    %132 = arith.mulf %131, %127 : vector<8x64xf32>
    %133 = arith.mulf %132, %127 : vector<8x64xf32>
    %134 = arith.addf %127, %133 : vector<8x64xf32>
    %cst_35 = arith.constant 0.797884583 : f32
    %135 = vector.broadcast %cst_35 : f32 to vector<8x64xf32>
    %136 = arith.mulf %135, %134 : vector<8x64xf32>
    %137 = math.tanh %136 : vector<8x64xf32>
    %cst_36 = arith.constant 1.000000e+00 : f32
    %138 = vector.broadcast %cst_36 : f32 to vector<8x64xf32>
    %139 = arith.addf %138, %137 : vector<8x64xf32>
    %140 = arith.mulf %129, %139 : vector<8x64xf32>
    %141 = arith.truncf %140 : vector<8x64xf32> to vector<8x64xbf16>
    %cst_37 = arith.constant dense<0.000000e+00> : vector<8x32xf32>
    %142 = tpu.matmul %141, %32, %cst_37 {dimension_numbers = #tpu.dot_dimension_numbers<[1], [0], [0], [1], [0, 0, 1, 1], [], []>} : vector<8x64xbf16>, vector<64x32xbf16>, vector<8x32xf32> -> vector<8x32xf32>
    %c7 = arith.constant 7 : index
    %c0_38 = arith.constant 0 : index
    %143 = vector.load %arg4[%c7, %c0_38] : memref<19x128xf32, #tpu.memory_space<vmem>>, vector<1x32xf32>
    %144 = vector.broadcast %143 : vector<1x32xf32> to vector<8x32xf32>
    %145 = arith.addf %142, %144 : vector<8x32xf32>
    %146 = arith.addf %145, %122 : vector<8x32xf32>
    %c8 = arith.constant 8 : index
    %c0_39 = arith.constant 0 : index
    %147 = vector.load %arg4[%c8, %c0_39] : memref<19x128xf32, #tpu.memory_space<vmem>>, vector<1x32xf32>
    %c9 = arith.constant 9 : index
    %c0_40 = arith.constant 0 : index
    %148 = vector.load %arg4[%c9, %c0_40] : memref<19x128xf32, #tpu.memory_space<vmem>>, vector<1x32xf32>
    %cst_41 = arith.constant dense<0.000000e+00> : vector<8xf32>
    %149 = vector.multi_reduction <add>, %146, %cst_41 [1] : vector<8x32xf32> to vector<8xf32>
    %150 = vector.shape_cast %149 : vector<8xf32> to vector<8x1xf32>
    %cst_42 = arith.constant 3.200000e+01 : f32
    %151 = vector.broadcast %cst_42 : f32 to vector<8x1xf32>
    %152 = arith.divf %150, %151 : vector<8x1xf32>
    %153 = vector.broadcast %152 : vector<8x1xf32> to vector<8x32xf32>
    %154 = arith.subf %146, %153 : vector<8x32xf32>
    %155 = vector.broadcast %152 : vector<8x1xf32> to vector<8x32xf32>
    %156 = arith.subf %146, %155 : vector<8x32xf32>
    %157 = arith.mulf %154, %156 : vector<8x32xf32>
    %cst_43 = arith.constant dense<0.000000e+00> : vector<8xf32>
    %158 = vector.multi_reduction <add>, %157, %cst_43 [1] : vector<8x32xf32> to vector<8xf32>
    %159 = vector.shape_cast %158 : vector<8xf32> to vector<8x1xf32>
    %cst_44 = arith.constant 3.200000e+01 : f32
    %160 = vector.broadcast %cst_44 : f32 to vector<8x1xf32>
    %161 = arith.divf %159, %160 : vector<8x1xf32>
    %162 = vector.broadcast %152 : vector<8x1xf32> to vector<8x32xf32>
    %163 = arith.subf %146, %162 : vector<8x32xf32>
    %cst_45 = arith.constant 9.99999996E-13 : f32
    %164 = vector.broadcast %cst_45 : f32 to vector<8x1xf32>
    %165 = arith.addf %161, %164 : vector<8x1xf32>
    %166 = math.rsqrt %165 : vector<8x1xf32>
    %167 = vector.broadcast %166 : vector<8x1xf32> to vector<8x32xf32>
    %168 = arith.mulf %163, %167 : vector<8x32xf32>
    %169 = vector.broadcast %147 : vector<1x32xf32> to vector<8x32xf32>
    %170 = arith.mulf %168, %169 : vector<8x32xf32>
    %171 = vector.broadcast %148 : vector<1x32xf32> to vector<8x32xf32>
    %172 = arith.addf %170, %171 : vector<8x32xf32>
    %c32 = arith.constant 32 : index
    %c0_46 = arith.constant 0 : index
    %173 = vector.load %arg3[%c32, %c0_46] : memref<352x128xbf16, #tpu.memory_space<vmem>>, vector<32x96xbf16>
    %c96 = arith.constant 96 : index
    %c0_47 = arith.constant 0 : index
    %174 = vector.load %arg3[%c96, %c0_47] : memref<352x128xbf16, #tpu.memory_space<vmem>>, vector<32x32xbf16>
    %c160 = arith.constant 160 : index
    %c0_48 = arith.constant 0 : index
    %175 = vector.load %arg3[%c160, %c0_48] : memref<352x128xbf16, #tpu.memory_space<vmem>>, vector<32x64xbf16>
    %c256 = arith.constant 256 : index
    %c0_49 = arith.constant 0 : index
    %176 = vector.load %arg3[%c256, %c0_49] : memref<352x128xbf16, #tpu.memory_space<vmem>>, vector<64x32xbf16>
    %177 = arith.truncf %172 : vector<8x32xf32> to vector<8x32xbf16>
    %cst_50 = arith.constant dense<0.000000e+00> : vector<8x96xf32>
    %178 = tpu.matmul %177, %173, %cst_50 {dimension_numbers = #tpu.dot_dimension_numbers<[1], [0], [0], [1], [0, 0, 1, 1], [], []>} : vector<8x32xbf16>, vector<32x96xbf16>, vector<8x96xf32> -> vector<8x96xf32>
    %c10 = arith.constant 10 : index
    %c0_51 = arith.constant 0 : index
    %179 = vector.load %arg4[%c10, %c0_51] : memref<19x128xf32, #tpu.memory_space<vmem>>, vector<1x96xf32>
    %180 = vector.broadcast %179 : vector<1x96xf32> to vector<8x96xf32>
    %181 = arith.addf %178, %180 : vector<8x96xf32>
    %182 = arith.truncf %181 : vector<8x96xf32> to vector<8x96xbf16>
    %183 = vector.extract_strided_slice %182 {offsets = [0, 0], sizes = [8, 8], strides = [1, 1]} : vector<8x96xbf16> to vector<8x8xbf16>
    %184 = vector.extract_strided_slice %182 {offsets = [0, 8], sizes = [8, 8], strides = [1, 1]} : vector<8x96xbf16> to vector<8x8xbf16>
    %185 = vector.extract_strided_slice %182 {offsets = [0, 16], sizes = [8, 8], strides = [1, 1]} : vector<8x96xbf16> to vector<8x8xbf16>
    %186 = vector.extract_strided_slice %182 {offsets = [0, 24], sizes = [8, 8], strides = [1, 1]} : vector<8x96xbf16> to vector<8x8xbf16>
    %187 = vector.shape_cast %183 : vector<8x8xbf16> to vector<1x8x8xbf16>
    %188 = vector.shape_cast %184 : vector<8x8xbf16> to vector<1x8x8xbf16>
    %189 = vector.shape_cast %185 : vector<8x8xbf16> to vector<1x8x8xbf16>
    %190 = vector.shape_cast %186 : vector<8x8xbf16> to vector<1x8x8xbf16>
    %191 = tpu.concatenate %187, %188, %189, %190 in 0 : vector<1x8x8xbf16>, vector<1x8x8xbf16>, vector<1x8x8xbf16>, vector<1x8x8xbf16> -> vector<4x8x8xbf16>
    %192 = vector.extract_strided_slice %182 {offsets = [0, 32], sizes = [8, 8], strides = [1, 1]} : vector<8x96xbf16> to vector<8x8xbf16>
    %193 = vector.extract_strided_slice %182 {offsets = [0, 40], sizes = [8, 8], strides = [1, 1]} : vector<8x96xbf16> to vector<8x8xbf16>
    %194 = vector.extract_strided_slice %182 {offsets = [0, 48], sizes = [8, 8], strides = [1, 1]} : vector<8x96xbf16> to vector<8x8xbf16>
    %195 = vector.extract_strided_slice %182 {offsets = [0, 56], sizes = [8, 8], strides = [1, 1]} : vector<8x96xbf16> to vector<8x8xbf16>
    %196 = vector.shape_cast %192 : vector<8x8xbf16> to vector<1x8x8xbf16>
    %197 = vector.shape_cast %193 : vector<8x8xbf16> to vector<1x8x8xbf16>
    %198 = vector.shape_cast %194 : vector<8x8xbf16> to vector<1x8x8xbf16>
    %199 = vector.shape_cast %195 : vector<8x8xbf16> to vector<1x8x8xbf16>
    %200 = tpu.concatenate %196, %197, %198, %199 in 0 : vector<1x8x8xbf16>, vector<1x8x8xbf16>, vector<1x8x8xbf16>, vector<1x8x8xbf16> -> vector<4x8x8xbf16>
    %201 = vector.extract_strided_slice %182 {offsets = [0, 64], sizes = [8, 8], strides = [1, 1]} : vector<8x96xbf16> to vector<8x8xbf16>
    %202 = vector.extract_strided_slice %182 {offsets = [0, 72], sizes = [8, 8], strides = [1, 1]} : vector<8x96xbf16> to vector<8x8xbf16>
    %203 = vector.extract_strided_slice %182 {offsets = [0, 80], sizes = [8, 8], strides = [1, 1]} : vector<8x96xbf16> to vector<8x8xbf16>
    %204 = vector.extract_strided_slice %182 {offsets = [0, 88], sizes = [8, 8], strides = [1, 1]} : vector<8x96xbf16> to vector<8x8xbf16>
    %205 = vector.shape_cast %201 : vector<8x8xbf16> to vector<1x8x8xbf16>
    %206 = vector.shape_cast %202 : vector<8x8xbf16> to vector<1x8x8xbf16>
    %207 = vector.shape_cast %203 : vector<8x8xbf16> to vector<1x8x8xbf16>
    %208 = vector.shape_cast %204 : vector<8x8xbf16> to vector<1x8x8xbf16>
    %209 = tpu.concatenate %205, %206, %207, %208 in 0 : vector<1x8x8xbf16>, vector<1x8x8xbf16>, vector<1x8x8xbf16>, vector<1x8x8xbf16> -> vector<4x8x8xbf16>
    "tpu.trace_start"() <{level = 10 : i32, message = "hqd,hkd->hqk"}> : () -> ()
    %cst_52 = arith.constant dense<0.000000e+00> : vector<4x8x8xf32>
    %210 = tpu.matmul %191, %200, %cst_52 {dimension_numbers = #tpu.dot_dimension_numbers<[2], [2], [1], [1], [0, 0, 0, 1, 1, 1], [0], [0]>} : vector<4x8x8xbf16>, vector<4x8x8xbf16>, vector<4x8x8xf32> -> vector<4x8x8xf32>
    "tpu.trace_stop"() : () -> ()
    %211 = vector.shape_cast %1 : vector<1x8xf32> to vector<1x1x8xf32>
    %212 = vector.broadcast %211 : vector<1x1x8xf32> to vector<4x8x8xf32>
    %213 = arith.addf %210, %212 : vector<4x8x8xf32>
    %cst_53 = arith.constant dense<0xFF800000> : vector<4x8xf32>
    %214 = vector.multi_reduction <maximumf>, %213, %cst_53 [2] : vector<4x8x8xf32> to vector<4x8xf32>
    %215 = vector.shape_cast %214 : vector<4x8xf32> to vector<4x8x1xf32>
    %216 = vector.broadcast %215 : vector<4x8x1xf32> to vector<4x8x8xf32>
    %217 = arith.subf %213, %216 : vector<4x8x8xf32>
    %218 = math.exp %217 : vector<4x8x8xf32>
    %cst_54 = arith.constant dense<0.000000e+00> : vector<4x8xf32>
    %219 = vector.multi_reduction <add>, %218, %cst_54 [2] : vector<4x8x8xf32> to vector<4x8xf32>
    %220 = vector.shape_cast %219 : vector<4x8xf32> to vector<4x8x1xf32>
    %221 = tpu.reciprocal %220 : vector<4x8x1xf32> -> vector<4x8x1xf32>
    %222 = vector.broadcast %221 : vector<4x8x1xf32> to vector<4x8x8xf32>
    %223 = arith.mulf %218, %222 : vector<4x8x8xf32>
    %224 = arith.truncf %223 : vector<4x8x8xf32> to vector<4x8x8xbf16>
    "tpu.trace_start"() <{level = 10 : i32, message = "hqk,hkd->hqd"}> : () -> ()
    %cst_55 = arith.constant dense<0.000000e+00> : vector<4x8x8xf32>
    %225 = tpu.matmul %224, %209, %cst_55 {dimension_numbers = #tpu.dot_dimension_numbers<[2], [1], [1], [2], [0, 0, 0, 1, 1, 2], [0], [0]>} : vector<4x8x8xbf16>, vector<4x8x8xbf16>, vector<4x8x8xf32> -> vector<4x8x8xf32>
    "tpu.trace_stop"() : () -> ()
    %226 = vector.extract_strided_slice %225 {offsets = [0, 0, 0], sizes = [1, 8, 8], strides = [1, 1, 1]} : vector<4x8x8xf32> to vector<1x8x8xf32>
    %227 = vector.shape_cast %226 : vector<1x8x8xf32> to vector<8x8xf32>
    %228 = vector.extract_strided_slice %225 {offsets = [1, 0, 0], sizes = [1, 8, 8], strides = [1, 1, 1]} : vector<4x8x8xf32> to vector<1x8x8xf32>
    %229 = vector.shape_cast %228 : vector<1x8x8xf32> to vector<8x8xf32>
    %230 = vector.extract_strided_slice %225 {offsets = [2, 0, 0], sizes = [1, 8, 8], strides = [1, 1, 1]} : vector<4x8x8xf32> to vector<1x8x8xf32>
    %231 = vector.shape_cast %230 : vector<1x8x8xf32> to vector<8x8xf32>
    %232 = vector.extract_strided_slice %225 {offsets = [3, 0, 0], sizes = [1, 8, 8], strides = [1, 1, 1]} : vector<4x8x8xf32> to vector<1x8x8xf32>
    %233 = vector.shape_cast %232 : vector<1x8x8xf32> to vector<8x8xf32>
    %234 = tpu.concatenate %227, %229, %231, %233 in 1 : vector<8x8xf32>, vector<8x8xf32>, vector<8x8xf32>, vector<8x8xf32> -> vector<8x32xf32>
    %235 = arith.truncf %234 : vector<8x32xf32> to vector<8x32xbf16>
    %cst_56 = arith.constant dense<0.000000e+00> : vector<8x32xf32>
    %236 = tpu.matmul %235, %174, %cst_56 {dimension_numbers = #tpu.dot_dimension_numbers<[1], [0], [0], [1], [0, 0, 1, 1], [], []>} : vector<8x32xbf16>, vector<32x32xbf16>, vector<8x32xf32> -> vector<8x32xf32>
    %c11 = arith.constant 11 : index
    %c0_57 = arith.constant 0 : index
    %237 = vector.load %arg4[%c11, %c0_57] : memref<19x128xf32, #tpu.memory_space<vmem>>, vector<1x32xf32>
    %238 = vector.broadcast %237 : vector<1x32xf32> to vector<8x32xf32>
    %239 = arith.addf %236, %238 : vector<8x32xf32>
    %240 = arith.addf %239, %172 : vector<8x32xf32>
    %c12 = arith.constant 12 : index
    %c0_58 = arith.constant 0 : index
    %241 = vector.load %arg4[%c12, %c0_58] : memref<19x128xf32, #tpu.memory_space<vmem>>, vector<1x32xf32>
    %c13 = arith.constant 13 : index
    %c0_59 = arith.constant 0 : index
    %242 = vector.load %arg4[%c13, %c0_59] : memref<19x128xf32, #tpu.memory_space<vmem>>, vector<1x32xf32>
    %cst_60 = arith.constant dense<0.000000e+00> : vector<8xf32>
    %243 = vector.multi_reduction <add>, %240, %cst_60 [1] : vector<8x32xf32> to vector<8xf32>
    %244 = vector.shape_cast %243 : vector<8xf32> to vector<8x1xf32>
    %cst_61 = arith.constant 3.200000e+01 : f32
    %245 = vector.broadcast %cst_61 : f32 to vector<8x1xf32>
    %246 = arith.divf %244, %245 : vector<8x1xf32>
    %247 = vector.broadcast %246 : vector<8x1xf32> to vector<8x32xf32>
    %248 = arith.subf %240, %247 : vector<8x32xf32>
    %249 = vector.broadcast %246 : vector<8x1xf32> to vector<8x32xf32>
    %250 = arith.subf %240, %249 : vector<8x32xf32>
    %251 = arith.mulf %248, %250 : vector<8x32xf32>
    %cst_62 = arith.constant dense<0.000000e+00> : vector<8xf32>
    %252 = vector.multi_reduction <add>, %251, %cst_62 [1] : vector<8x32xf32> to vector<8xf32>
    %253 = vector.shape_cast %252 : vector<8xf32> to vector<8x1xf32>
    %cst_63 = arith.constant 3.200000e+01 : f32
    %254 = vector.broadcast %cst_63 : f32 to vector<8x1xf32>
    %255 = arith.divf %253, %254 : vector<8x1xf32>
    %256 = vector.broadcast %246 : vector<8x1xf32> to vector<8x32xf32>
    %257 = arith.subf %240, %256 : vector<8x32xf32>
    %cst_64 = arith.constant 9.99999996E-13 : f32
    %258 = vector.broadcast %cst_64 : f32 to vector<8x1xf32>
    %259 = arith.addf %255, %258 : vector<8x1xf32>
    %260 = math.rsqrt %259 : vector<8x1xf32>
    %261 = vector.broadcast %260 : vector<8x1xf32> to vector<8x32xf32>
    %262 = arith.mulf %257, %261 : vector<8x32xf32>
    %263 = vector.broadcast %241 : vector<1x32xf32> to vector<8x32xf32>
    %264 = arith.mulf %262, %263 : vector<8x32xf32>
    %265 = vector.broadcast %242 : vector<1x32xf32> to vector<8x32xf32>
    %266 = arith.addf %264, %265 : vector<8x32xf32>
    %267 = arith.truncf %266 : vector<8x32xf32> to vector<8x32xbf16>
    %cst_65 = arith.constant dense<0.000000e+00> : vector<8x64xf32>
    %268 = tpu.matmul %267, %175, %cst_65 {dimension_numbers = #tpu.dot_dimension_numbers<[1], [0], [0], [1], [0, 0, 1, 1], [], []>} : vector<8x32xbf16>, vector<32x64xbf16>, vector<8x64xf32> -> vector<8x64xf32>
    %c14 = arith.constant 14 : index
    %c0_66 = arith.constant 0 : index
    %269 = vector.load %arg4[%c14, %c0_66] : memref<19x128xf32, #tpu.memory_space<vmem>>, vector<1x64xf32>
    %270 = vector.broadcast %269 : vector<1x64xf32> to vector<8x64xf32>
    %271 = arith.addf %268, %270 : vector<8x64xf32>
    %cst_67 = arith.constant 5.000000e-01 : f32
    %272 = vector.broadcast %cst_67 : f32 to vector<8x64xf32>
    %273 = arith.mulf %272, %271 : vector<8x64xf32>
    %cst_68 = arith.constant 4.471500e-02 : f32
    %274 = vector.broadcast %cst_68 : f32 to vector<8x64xf32>
    %275 = arith.mulf %274, %271 : vector<8x64xf32>
    %276 = arith.mulf %275, %271 : vector<8x64xf32>
    %277 = arith.mulf %276, %271 : vector<8x64xf32>
    %278 = arith.addf %271, %277 : vector<8x64xf32>
    %cst_69 = arith.constant 0.797884583 : f32
    %279 = vector.broadcast %cst_69 : f32 to vector<8x64xf32>
    %280 = arith.mulf %279, %278 : vector<8x64xf32>
    %281 = math.tanh %280 : vector<8x64xf32>
    %cst_70 = arith.constant 1.000000e+00 : f32
    %282 = vector.broadcast %cst_70 : f32 to vector<8x64xf32>
    %283 = arith.addf %282, %281 : vector<8x64xf32>
    %284 = arith.mulf %273, %283 : vector<8x64xf32>
    %285 = arith.truncf %284 : vector<8x64xf32> to vector<8x64xbf16>
    %cst_71 = arith.constant dense<0.000000e+00> : vector<8x32xf32>
    %286 = tpu.matmul %285, %176, %cst_71 {dimension_numbers = #tpu.dot_dimension_numbers<[1], [0], [0], [1], [0, 0, 1, 1], [], []>} : vector<8x64xbf16>, vector<64x32xbf16>, vector<8x32xf32> -> vector<8x32xf32>
    %c15 = arith.constant 15 : index
    %c0_72 = arith.constant 0 : index
    %287 = vector.load %arg4[%c15, %c0_72] : memref<19x128xf32, #tpu.memory_space<vmem>>, vector<1x32xf32>
    %288 = vector.broadcast %287 : vector<1x32xf32> to vector<8x32xf32>
    %289 = arith.addf %286, %288 : vector<8x32xf32>
    %290 = arith.addf %289, %266 : vector<8x32xf32>
    %c16 = arith.constant 16 : index
    %c0_73 = arith.constant 0 : index
    %291 = vector.load %arg4[%c16, %c0_73] : memref<19x128xf32, #tpu.memory_space<vmem>>, vector<1x32xf32>
    %c17 = arith.constant 17 : index
    %c0_74 = arith.constant 0 : index
    %292 = vector.load %arg4[%c17, %c0_74] : memref<19x128xf32, #tpu.memory_space<vmem>>, vector<1x32xf32>
    %cst_75 = arith.constant dense<0.000000e+00> : vector<8xf32>
    %293 = vector.multi_reduction <add>, %290, %cst_75 [1] : vector<8x32xf32> to vector<8xf32>
    %294 = vector.shape_cast %293 : vector<8xf32> to vector<8x1xf32>
    %cst_76 = arith.constant 3.200000e+01 : f32
    %295 = vector.broadcast %cst_76 : f32 to vector<8x1xf32>
    %296 = arith.divf %294, %295 : vector<8x1xf32>
    %297 = vector.broadcast %296 : vector<8x1xf32> to vector<8x32xf32>
    %298 = arith.subf %290, %297 : vector<8x32xf32>
    %299 = vector.broadcast %296 : vector<8x1xf32> to vector<8x32xf32>
    %300 = arith.subf %290, %299 : vector<8x32xf32>
    %301 = arith.mulf %298, %300 : vector<8x32xf32>
    %cst_77 = arith.constant dense<0.000000e+00> : vector<8xf32>
    %302 = vector.multi_reduction <add>, %301, %cst_77 [1] : vector<8x32xf32> to vector<8xf32>
    %303 = vector.shape_cast %302 : vector<8xf32> to vector<8x1xf32>
    %cst_78 = arith.constant 3.200000e+01 : f32
    %304 = vector.broadcast %cst_78 : f32 to vector<8x1xf32>
    %305 = arith.divf %303, %304 : vector<8x1xf32>
    %306 = vector.broadcast %296 : vector<8x1xf32> to vector<8x32xf32>
    %307 = arith.subf %290, %306 : vector<8x32xf32>
    %cst_79 = arith.constant 9.99999996E-13 : f32
    %308 = vector.broadcast %cst_79 : f32 to vector<8x1xf32>
    %309 = arith.addf %305, %308 : vector<8x1xf32>
    %310 = math.rsqrt %309 : vector<8x1xf32>
    %311 = vector.broadcast %310 : vector<8x1xf32> to vector<8x32xf32>
    %312 = arith.mulf %307, %311 : vector<8x32xf32>
    %313 = vector.broadcast %291 : vector<1x32xf32> to vector<8x32xf32>
    %314 = arith.mulf %312, %313 : vector<8x32xf32>
    %315 = vector.broadcast %292 : vector<1x32xf32> to vector<8x32xf32>
    %316 = arith.addf %314, %315 : vector<8x32xf32>
    %c320 = arith.constant 320 : index
    %c0_80 = arith.constant 0 : index
    %317 = vector.load %arg3[%c320, %c0_80] : memref<352x128xbf16, #tpu.memory_space<vmem>>, vector<32x128xbf16>
    %318 = arith.truncf %316 : vector<8x32xf32> to vector<8x32xbf16>
    %cst_81 = arith.constant dense<0.000000e+00> : vector<8x128xf32>
    %319 = tpu.matmul %318, %317, %cst_81 {dimension_numbers = #tpu.dot_dimension_numbers<[1], [0], [0], [1], [0, 0, 1, 1], [], []>} : vector<8x32xbf16>, vector<32x128xbf16>, vector<8x128xf32> -> vector<8x128xf32>
    %c18 = arith.constant 18 : index
    %c0_82 = arith.constant 0 : index
    %320 = vector.load %arg4[%c18, %c0_82] : memref<19x128xf32, #tpu.memory_space<vmem>>, vector<1x128xf32>
    %321 = vector.broadcast %320 : vector<1x128xf32> to vector<8x128xf32>
    %322 = arith.addf %319, %321 : vector<8x128xf32>
    %c0_83 = arith.constant 0 : index
    %c0_84 = arith.constant 0 : index
    %323 = vector.load %arg5[%c0_83, %c0_84] : memref<8x128xf32, #tpu.memory_space<vmem>>, vector<8x128xf32>
    tpu.vector_store %arg5[%c0_83, %c0_84], %322 {strides = array<i32>} : memref<8x128xf32, #tpu.memory_space<vmem>>, vector<8x128xf32>,
    return
  }
  func.func @transform_0(%arg0: i32) -> (i32, i32) {
    %c0_i32 = arith.constant 0 : i32
    %c0_i32_0 = arith.constant 0 : i32
    return %arg0, %c0_i32 : i32, i32
  }
  func.func @transform_1(%arg0: i32) -> (i32, i32, i32) {
    %c0_i32 = arith.constant 0 : i32
    %c0_i32_0 = arith.constant 0 : i32
    %c0_i32_1 = arith.constant 0 : i32
    return %arg0, %c0_i32, %c0_i32_0 : i32, i32, i32
  }
  func.func @transform_2(%arg0: i32) -> (i32, i32) {
    %c0_i32 = arith.constant 0 : i32
    %c0_i32_0 = arith.constant 0 : i32
    %c0_i32_1 = arith.constant 0 : i32
    return %c0_i32, %c0_i32_0 : i32, i32
  }
  func.func @transform_3(%arg0: i32) -> (i32, i32) {
    %c0_i32 = arith.constant 0 : i32
    %c0_i32_0 = arith.constant 0 : i32
    %c0_i32_1 = arith.constant 0 : i32
    return %c0_i32, %c0_i32_0 : i32, i32
  }
  func.func @transform_4(%arg0: i32) -> (i32, i32) {
    %c0_i32 = arith.constant 0 : i32
    %c0_i32_0 = arith.constant 0 : i32
    return %arg0, %c0_i32 : i32, i32
  }
}

</mosaic_0001>

<bundles_post_ra>
// kernel: bert_crf_forward.1
= control target key start
LH: loop header
LB: loop body
LE: loop exit
PB: predicated region body
PF: predicated region fallthrough
CT: control target
= control target key end

     0   :  { %s1667_s15 = smov 0   ;;  %s2000_s0 = inlined_call_operand.vmem [shape: f32[16,32], index: 0, kind: input, shape index: {}]   ;;  %s2001_s1 = inlined_call_operand.vmem [shape: f32[2,1,8], index: 1, kind: input, shape index: {}]   ;;  %s2002_s2 = inlined_call_operand.vmem [shape: bf16[352,128], index: 2, kind: input, shape index: {}]   ;;  %s2003_s3 = inlined_call_operand.vmem [shape: f32[19,128], index: 3, kind: input, shape index: {}]   ;;  %s2004_s4 = inlined_call_operand.vmem [shape: f32[16,128], index: 4, kind: output, shape index: {}]  }
   0x1 LB: > { %s1396_s16 = sadd.s32 4294967295, %s1631_s15   ;;  %p1400_p0 = scmp.ge.s32.totalorder %s1631_s15, 1  ;;  %s1631_s15 = sphi %s1667_s15, %s14_s15  }
   0x2   : > { %p169_p1 = scmp.lt.s32.totalorder %s1631_s15, 3 }
   0x4   : > { %p170_p2 = pnand %p1400_p0, %p169_p1 }
   0x5   : > { %p196_p3 = scmp.lt.s32.totalorder (!%p170_p2), %s1396_s16, 1  ;;  %s1634_s8 = smov (!%p170_p2), 104  }
   0x6   : > { %173 = sbr.rel (%p170_p2) target bundleno = 4392 (0x1128), region = 36  ;;  %s1635_s9 = smov (!%p170_p2), 120  }
   0x7   : > { %s1636_s10 = smov (!%p170_p2), 112   ;;  %s1637_s11 = smov (!%p170_p2), 96  }
   0x8   : > { %s1638_s14 = smov (!%p170_p2), 64   ;;  %s1639_s18 = smov (!%p170_p2), 8  }
   0x9   : > { %s1640_s19 = smov (!%p170_p2), 24  }
   0xb   : > { %s2006_s16 = smov (!%p196_p3, %s1396_s16), 1  ;;  %vm212_vm0 = vcmask 261120   ;;  %v1633_v2 = vmov 32.0   ;;  %v1519_v14 = vld [vmem:[%s2002_s2 + $0x8] sm:$0xff]  ;;  %v1518_v15 = vld [vmem:[%s2002_s2] sm:$0xff]  ;;  %vm312_vm5 = vcmask 64512  }
   0xc   : > { %s1401_s17 = sshll.u32 %s2006_s16, 3  ;;  %s202_s20 = scalar_lea.vmem %s2001_s1, %s2006_s16  ;;  %1577 = vrcp.f32 %v1633_v2  ;;  %290 = vmatpush.bf16.msra.mxu0 %v1519_v14  ;;  %v1558_v25 = vld [vmem:[%s2003_s3] ss:$0 sm:$0xff]  ;;  %v1559_v28 = vld [vmem:[%s2003_s3 + $0x1] ss:$0 sm:$0xff]  ;;  %vm506_vm6 = vcmask 1043456  }
   0xd   : > { %s199_s23 = scalar_lea.vmem %s2000_s0, %s1401_s17  ;;  %v1560_v32 = vld [vmem:[%s2003_s3 + $0x2] ss:$0 sm:$0xff]  ;;  %v1742_v56 = vld [vmem:[%s202_s20] ss:$0 sm:$0xff]  ;;  %s1641_s20 = smov 16  }
   0xe   : > { %v209_v0 = vld [vmem:[%s199_s23] sm:$0xff]  ;;  %s206_s12 = scalar_lea.vmem %s2004_s4, %s1401_s17 }
   0xf   : > { %v213_v1 = vsel %vm212_vm0, %v209_v0, 0.0 }
  0x10   : > { %214 = vadd.xlane.f32.xlu0 %v213_v1  ;;  %291 = vmatpush.bf16.msra.mxu0 %v1518_v15 }
  0x12   : > { %v1578_v3 = vpop.eup %1577 }
  0x13   : > { %v217_v4 = vmul.f32 32.0, %v1578_v3  ;;  %vm221_vm1 = vweird.f32 %v1578_v3 }
  0x15   : > { %v218_v5 = vsub.f32 1.0, %v217_v4 }
  0x17   : > { %v219_v6 = vmul.f32 %v1578_v3, %v218_v5 }
  0x19   : > { %v220_v7 = vadd.f32 %v1578_v3, %v219_v6 }
  0x1b   : > { %v1688_v8 = vsel %vm221_vm1, %v1578_v3, %v220_v7 }
  0x83   : > { %v215_v9 = vpop.xlane.xlu0 %214 }
  0x84   : > { %v223_v10 = vmul.f32 %v1688_v8, %v215_v9 }
  0x86   : > { %v224_v11 = vsub.f32 %v209_v0, %v223_v10 }
  0x88   : > { %v225_v12 = vmul.f32 %v224_v11, %v224_v11 }
  0x8a   : > { %v226_v13 = vsel %vm212_vm0, %v225_v12, 0.0 }
  0x8b   : > { %227 = vadd.xlane.f32.xlu0 %v226_v13 }
  0xfe   : > { %v228_v16 = vpop.xlane.xlu0 %227 }
  0xff   : > { %v229_v17 = vmul.f32 %v228_v16, %v1688_v8 }
 0x101   : > { %v230_v18 = vadd.f32 1e-12, %v229_v17 }
 0x103   : > { %1579 = vrsqrt.f32 %v230_v18  ;;  %vm237_vm3 = vweird.f32 %v230_v18 }
 0x109   : > { %v1580_v19 = vpop.eup %1579 }
 0x10a   : > { %v232_v20 = vmul.f32 %v1580_v19, %v230_v18  ;;  %vm238_vm2 = vweird.f32 %v1580_v19 }
 0x10b   : > { %vm239_vm4 = vmor %vm237_vm3, %vm238_vm2 }
 0x10c   : > { %v233_v21 = vmul.f32 %v1580_v19, %v232_v20 }
 0x10e   : > { %v234_v22 = vmul.f32 0.5, %v233_v21 }
 0x110   : > { %v235_v23 = vsub.f32 1.5, %v234_v22 }
 0x112   : > { %v236_v24 = vmul.f32 %v1580_v19, %v235_v23 }
 0x114   : > { %v240_v26 = vsel %vm239_vm4, %v1580_v19, %v236_v24 }
 0x115   : > { %v241_v27 = vmul.f32 %v240_v26, %v224_v11 }
 0x117   : > { %v243_v29 = vmul.f32 %v1558_v25, %v241_v27 }
 0x119   : > { %v1705_v30 = vadd.f32 %v1559_v28, %v243_v29 }
 0x11b   : > { %v266_v31 = vpack.c.bf16 %v1705_v30, %v1705_v30 }
 0x11d   : > { %1411 = vmatmul.msk.bf16.vlgmr.msra.gmra.mxu0 %vm212_vm0, %v266_v31 }
 0x19a   : > { %v293_v33 = vpop.f32.mrf.mxu0 }
 0x19b   : > { %v294_v34 = vadd.f32 %v1560_v32, %v293_v33 }
 0x19d   : > { %v297_v35 = vpack.c.bf16 %v294_v34, %v294_v34 }
 0x19f   : > { %303 = vrot.lane.b32.xlu2 %v297_v35, %s1634_s8  ;;  %299 = vrot.lane.b32.xlu1 %v297_v35, %s1635_s9  ;;  %v308_v43 = vunpack.c.l.b16 %v297_v35 }
 0x1a1   : > { %v1723_v47 = vpack.c.b16 %v308_v43, %v308_v43 }
 0x1a2   : > { %v295_v36 = vpop.f32.mrf.mxu0 }
 0x1a7   : > { %301 = vrot.lane.b32.xlu1 %v297_v35, %s1636_s10 }
 0x1f9   : > { %v304_v37 = vpop.permute.xlu2 %303 }
 0x1fa   : > { %v378_v38 = vunpack.c.l.b16 %v304_v37 }
 0x1fc   : > { %v1716_v39 = vpack.c.b16 %v378_v38, %v378_v38 }
 0x1fe   : > { %380 = vrot.lane.b32.xlu1 %v1716_v39, %s1637_s11 }
 0x211   : > { %v300_v40 = vpop.permute.xlu1 %299 }
 0x212   : > { %v332_v41 = vunpack.c.l.b16 %v300_v40 }
 0x214   : > { %v333_v42 = vpack.c.b16 %v332_v41, %v332_v41 }
 0x216   : > { %334 = vrot.lane.b32.xlu2 %v333_v42, %s1637_s11 }
 0x219   : > { %v302_v44 = vpop.permute.xlu1 %301 }
 0x21a   : > { %v355_v45 = vunpack.c.l.b16 %v302_v44 }
 0x21c   : > { %v1721_v46 = vpack.c.b16 %v355_v45, %v355_v45 }
 0x21e   : > { %357 = vrot.lane.b32.xlu0 %v1721_v46, %s1637_s11  ;;  %310 = vrot.lane.b32.xlu2 %v1723_v47, %s1637_s11 }
 0x270   : > { %v335_v48 = vpop.permute.xlu2 %334  ;;  %v381_v49 = vpop.permute.xlu1 %380 }
 0x271   : > { %v340_v50 = vsel %vm312_vm5, %v335_v48, 0  ;;  %v386_v51 = vsel %vm312_vm5, %v381_v49, 0 }
 0x272   : > { %349 = vmatpush.bf16.xpose.msra.mxu2 %v340_v50  ;;  %395 = vmatpush.bf16.xpose.msrb.mxu0 %v386_v51 }
 0x278   : > { %v311_v52 = vpop.permute.xlu2 %310 }
 0x279   : > { %1413 = vmatmul.msk.bf16.vlgmr.msra.gmra.mxu2 %vm312_vm5, %v300_v40  ;;  %1415 = vmatmul.msk.bf16.vlgmr.msrb.gmra.mxu0 %vm312_vm5, %v304_v37  ;;  %v317_v53 = vsel %vm312_vm5, %v311_v52, 0 }
 0x27a   : > { %326 = vmatpush.bf16.xpose.msra.mxu1 %v317_v53 }
 0x281   : > { %1412 = vmatmul.msk.bf16.vlgmr.msra.gmra.mxu1 %vm312_vm5, %v297_v35 }
 0x290   : > { %v358_v54 = vpop.permute.xlu0 %357 }
 0x291   : > { %v363_v55 = vsel %vm312_vm5, %v358_v54, 0 }
 0x292   : > { %372 = vmatpush.bf16.xpose.msra.mxu3 %v363_v55 }
 0x299   : > { %1414 = vmatmul.msk.bf16.vlgmr.msra.gmra.mxu3 %vm312_vm5, %v302_v44 }
 0x2f6   : > { %v397_v57 = vpop.f32.mrf.mxu0 }
 0x2f7   : > { %v398_v58 = vadd.f32 %v1742_v56, %v397_v57 }
 0x2f9   : > { %v410_v59 = vsel %vm312_vm5, %v398_v58, -inf }
 0x2fa   : > { %411 = vmax.xlane.f32.xlu0 %v410_v59 }
 0x2fc   : > { %v351_v60 = vpop.f32.mrf.mxu2 }
 0x2fd   : > { %v352_v61 = vadd.f32 %v1742_v56, %v351_v60 }
 0x2fe   : > { %v328_v62 = vpop.f32.mrf.mxu1  ;;  %v399_v63 = vpop.f32.mrf.mxu0 }
 0x2ff   : > { %v404_v0 = vsel %vm312_vm5, %v352_v61, -inf  ;;  %v329_v6 = vadd.f32 %v1742_v56, %v328_v62 }
 0x300   : > { %405 = vmax.xlane.f32.xlu1 %v404_v0 }
 0x301   : > { %v401_v9 = vsel %vm312_vm5, %v329_v6, -inf }
 0x304   : > { %v353_v1 = vpop.f32.mrf.mxu2 }
 0x306   : > { %v330_v2 = vpop.f32.mrf.mxu1 }
 0x30e   : > { %523 = vrot.lane.b32.xlu0 %v333_v42, %s1638_s14 }
 0x31c   : > { %v374_v3 = vpop.f32.mrf.mxu3 }
 0x31d   : > { %v375_v4 = vadd.f32 %v1742_v56, %v374_v3 }
 0x31f   : > { %v407_v5 = vsel %vm312_vm5, %v375_v4, -inf }
 0x320   : > { %408 = vmax.xlane.f32.xlu2 %v407_v5 }
 0x324   : > { %v376_v7 = vpop.f32.mrf.mxu3 }
 0x328   : > { %402 = vmax.xlane.f32.xlu2 %v401_v9 }
 0x36d   : > { %v412_v10 = vpop.xlane.xlu0 %411 }
 0x36e   : > { %v416_v11 = vsub.f32 %v398_v58, %v412_v10 }
 0x370   : > { %v423_v12 = vmul.f32 1.442695, %v416_v11 }
 0x372   : > { %1581 = vpow2.f32 %v423_v12 }
 0x373   : > { %v406_v13 = vpop.xlane.xlu1 %405 }
 0x374   : > { %v414_v14 = vsub.f32 %v352_v61, %v406_v13 }
 0x376   : > { %v419_v15 = vmul.f32 1.442695, %v414_v14 }
 0x378   : > { %v1753_v16 = vpop.eup %1581  ;;  %1583 = vpow2.f32 %v419_v15 }
 0x379   : > { %v434_v17 = vsel %vm312_vm5, %v1753_v16, 0.0 }
 0x37a   : > { %435 = vadd.xlane.f32.xlu1 %v434_v17 }
 0x37e   : > { %v1584_v18 = vpop.eup %1583 }
 0x37f   : > { %v428_v21 = vsel %vm312_vm5, %v1584_v18, 0.0 }
 0x380   : > { %v524_v19 = vpop.permute.xlu0 %523 }
 0x381   : > { %v529_v20 = vsel %vm506_vm6, %v524_v19, 0 }
 0x382   : > { %538 = vmatpush.bf16.msrb.mxu2 %v529_v20  ;;  %429 = vadd.xlane.f32.xlu1 %v428_v21 }
 0x393   : > { %v409_v22 = vpop.xlane.xlu2 %408 }
 0x394   : > { %v415_v23 = vsub.f32 %v375_v4, %v409_v22 }
 0x396   : > { %v421_v24 = vmul.f32 1.442695, %v415_v23 }
 0x398   : > { %1585 = vpow2.f32 %v421_v24 }
 0x39b   : > { %565 = vrot.lane.b32.xlu1 %v1716_v39, %s1638_s14  ;;  %v403_v25 = vpop.xlane.xlu2 %402 }
 0x39c   : > { %v413_v26 = vsub.f32 %v329_v6, %v403_v25 }
 0x39e   : > { %v1761_v27 = vpop.eup %1585  ;;  %v417_v28 = vmul.f32 1.442695, %v413_v26 }
 0x39f   : > { %v431_v29 = vsel %vm312_vm5, %v1761_v27, 0.0 }
 0x3a0   : > { %1587 = vpow2.f32 %v417_v28  ;;  %432 = vadd.xlane.f32.xlu2 %v431_v29 }
 0x3a6   : > { %v1765_v31 = vpop.eup %1587 }
 0x3a7   : > { %v425_v32 = vsel %vm312_vm5, %v1765_v31, 0.0 }
 0x3a8   : > { %426 = vadd.xlane.f32.xlu0 %v425_v32 }
 0x3b8   : > { %544 = vrot.lane.b32.xlu2 %v1721_v46, %s1638_s14 }
 0x3c0   : > { %501 = vrot.lane.b32.xlu2 %v1723_v47, %s1638_s14 }
 0x3ed   : > { %v436_v33 = vpop.xlane.xlu1 %435 }
 0x3ee   : > { %1589 = vrcp.f32 %v436_v33  ;;  %v490_v46 = vand.u32 2147483648, %v436_v33  ;;  %vm484_vm10 = vweird.f32 %v436_v33  ;;  %v488_v47 = vand.u32 2147483647, %v436_v33 }
 0x3f0   : > { %v491_v53 = vor.u32 1.1754944e-38, %v490_v46  ;;  %vm489_vm14 = vcmp.eq.f32.partialorder %v488_v47, 8.507059e+37 }
 0x3f4   : > { %v1590_v34 = vpop.eup %1589 }
 0x3f5   : > { %v430_v35 = vpop.xlane.xlu1 %429  ;;  %v480_v36 = vmul.f32 %v1590_v34, %v436_v33  ;;  %vm485_vm8 = vweird.f32 %v1590_v34 }
 0x3f6   : > { %1591 = vrcp.f32 %v430_v35  ;;  %v462_v42 = vand.u32 2147483648, %v430_v35  ;;  %v460_v44 = vand.u32 2147483647, %v430_v35  ;;  %vm456_vm9 = vweird.f32 %v430_v35  ;;  %vm486_vm12 = vmor %vm484_vm10, %vm485_vm8 }
 0x3f7   : > { %v481_v37 = vsub.f32 1.0, %v480_v36  ;;  %vm599_vm10 = vcmask 130048  }
 0x3f8   : > { %v463_v49 = vor.u32 1.1754944e-38, %v462_v42  ;;  %vm461_vm13 = vcmp.eq.f32.partialorder %v460_v44, 8.507059e+37 }
 0x3f9   : > { %v482_v40 = vmul.f32 %v1590_v34, %v481_v37 }
 0x3fb   : > { %v483_v45 = vadd.f32 %v1590_v34, %v482_v40 }
 0x3fc   : > { %v1592_v38 = vpop.eup %1591 }
 0x3fd   : > { %v452_v39 = vmul.f32 %v1592_v38, %v430_v35  ;;  %vm457_vm7 = vweird.f32 %v1592_v38  ;;  %v487_v51 = vsel %vm486_vm12, %v1590_v34, %v483_v45 }
 0x3fe   : > { %vm458_vm11 = vmor %vm456_vm9, %vm457_vm7  ;;  %v492_v55 = vsel %vm489_vm14, %v491_v53, %v487_v51 }
 0x3ff   : > { %v453_v41 = vsub.f32 1.0, %v452_v39  ;;  %v496_v58 = vmul.f32 %v1753_v16, %v492_v55  ;;  %v1520_v39 = vld [vmem:[%s2002_s2 + $0x20] sm:$0xff] }
 0x401   : > { %v454_v43 = vmul.f32 %v1592_v38, %v453_v41  ;;  %v500_v61 = vpack.c.bf16 %v496_v58, %v496_v58 }
 0x403   : > { %v455_v48 = vadd.f32 %v1592_v38, %v454_v43 }
 0x405   : > { %v459_v50 = vsel %vm458_vm11, %v1592_v38, %v455_v48  ;;  %v1521_v38 = vld [vmem:[%s2002_s2 + $0x28] sm:$0xff]  ;;  %vm601_vm11 = vcmask 195584   ;;  %v1561_v48 = vld [vmem:[%s2003_s3 + $0x3] ss:$0 sm:$0xff] }
 0x406   : > { %v464_v52 = vsel %vm461_vm13, %v463_v49, %v459_v50 }
 0x407   : > { %v494_v54 = vmul.f32 %v1584_v18, %v464_v52 }
 0x409   : > { %v498_v57 = vpack.c.bf16 %v494_v54, %v494_v54 }
 0x40b   : > { %1417 = vmatmul.msk.bf16.vlgmr.msrb.gmra.mxu2 %vm312_vm5, %v498_v57 }
 0x40d   : > { %v566_v59 = vpop.permute.xlu1 %565 }
 0x40e   : > { %v571_v60 = vsel %vm506_vm6, %v566_v59, 0  ;;  %v1523_v59 = vld [vmem:[%s2002_s2 + $0x48] sm:$0xff] }
 0x40f   : > { %580 = vmatpush.bf16.msra.mxu0 %v571_v60  ;;  %687 = vmatpush.bf16.msra.mxu2 %v1523_v59 }
 0x412   : > { %1419 = vmatmul.msk.bf16.vlgmr.msra.gmra.mxu0 %vm312_vm5, %v500_v61 }
 0x413   : > { %v433_v62 = vpop.xlane.xlu2 %432 }
 0x414   : > { %1593 = vrcp.f32 %v433_v62  ;;  %v476_v5 = vand.u32 2147483648, %v433_v62  ;;  %v474_v7 = vand.u32 2147483647, %v433_v62  ;;  %vm470_vm1 = vweird.f32 %v433_v62 }
 0x416   : > { %v477_v11 = vor.u32 1.1754944e-38, %v476_v5  ;;  %vm475_vm3 = vcmp.eq.f32.partialorder %v474_v7, 8.507059e+37  ;;  %v1562_v5 = vld [vmem:[%s2003_s3 + $0x4] ss:$0 sm:$0xff]  ;;  %v1563_v7 = vld [vmem:[%s2003_s3 + $0x5] ss:$0 sm:$0xff] }
 0x41a   : > { %v1594_v63 = vpop.eup %1593 }
 0x41b   : > { %v466_v0 = vmul.f32 %v1594_v63, %v433_v62  ;;  %v427_v1 = vpop.xlane.xlu0 %426  ;;  %v545_v2 = vpop.permute.xlu2 %544  ;;  %vm471_vm15 = vweird.f32 %v1594_v63 }
 0x41c   : > { %1595 = vrcp.f32 %v427_v1  ;;  %v550_v4 = vsel %vm506_vm6, %v545_v2, 0  ;;  %vm472_vm2 = vmor %vm470_vm1, %vm471_vm15  ;;  %v448_v19 = vand.u32 2147483648, %v427_v1  ;;  %v446_v21 = vand.u32 2147483647, %v427_v1 }
 0x41d   : > { %v467_v3 = vsub.f32 1.0, %v466_v0  ;;  %559 = vmatpush.bf16.msrb.mxu3 %v550_v4  ;;  %vm442_vm7 = vweird.f32 %v427_v1  ;;  %vm730_vm15 = vcmask 523264  }
 0x41e   : > { %v449_v24 = vor.u32 1.1754944e-38, %v448_v19  ;;  %vm447_vm9 = vcmp.eq.f32.partialorder %v446_v21, 8.507059e+37 }
 0x41f   : > { %v468_v6 = vmul.f32 %v1594_v63, %v467_v3 }
 0x421   : > { %v469_v9 = vadd.f32 %v1594_v63, %v468_v6 }
 0x422   : > { %v1596_v10 = vpop.eup %1595 }
 0x423   : > { %v438_v12 = vmul.f32 %v1596_v10, %v427_v1  ;;  %v502_v13 = vpop.permute.xlu2 %501  ;;  %v473_v14 = vsel %vm472_vm2, %v1594_v63, %v469_v9  ;;  %vm443_vm4 = vweird.f32 %v1596_v10 }
 0x424   : > { %v508_v15 = vsel %vm506_vm6, %v502_v13, 0  ;;  %v478_v16 = vsel %vm475_vm3, %v477_v11, %v473_v14  ;;  %vm444_vm8 = vmor %vm442_vm7, %vm443_vm4  ;;  %v1527_v13 = vld [vmem:[%s2002_s2 + $0x78] sm:$0xff]  ;;  %v1526_v14 = vld [vmem:[%s2002_s2 + $0x70] sm:$0xff] }
 0x425   : > { %v439_v17 = vsub.f32 1.0, %v438_v12  ;;  %517 = vmatpush.bf16.msrb.mxu1 %v508_v15  ;;  %v495_v18 = vmul.f32 %v1761_v27, %v478_v16  ;;  %738 = vmatpush.bf16.msra.mxu3 %v1527_v13  ;;  %v1525_v15 = vld [vmem:[%s2002_s2 + $0x68] sm:$0xff]  ;;  %v1524_v16 = vld [vmem:[%s2002_s2 + $0x60] sm:$0xff] }
 0x427   : > { %v440_v20 = vmul.f32 %v1596_v10, %v439_v17  ;;  %v499_v22 = vpack.c.bf16 %v495_v18, %v495_v18  ;;  %v1564_v17 = vld [vmem:[%s2003_s3 + $0x6] ss:$0 sm:$0xff] }
 0x429   : > { %v441_v23 = vadd.f32 %v1596_v10, %v440_v20  ;;  %1418 = vmatmul.msk.bf16.vlgmr.msrb.gmra.mxu3 %vm312_vm5, %v499_v22  ;;  %627 = vmatpush.bf16.msra.mxu1 %v1521_v38 }
 0x42a   : > { %739 = vmatpush.bf16.msra.mxu3 %v1526_v14 }
 0x42b   : > { %v445_v25 = vsel %vm444_vm8, %v1596_v10, %v441_v23 }
 0x42c   : > { %v450_v26 = vsel %vm447_vm9, %v449_v24, %v445_v25 }
 0x42d   : > { %v493_v28 = vmul.f32 %v1765_v31, %v450_v26  ;;  %628 = vmatpush.bf16.msra.mxu1 %v1520_v39 }
 0x42e   : > { %740 = vmatpush.bf16.msra.mxu3 %v1525_v15 }
 0x42f   : > { %v497_v29 = vpack.c.bf16 %v493_v28, %v493_v28 }
 0x431   : > { %1416 = vmatmul.msk.bf16.vlgmr.msrb.gmra.mxu1 %vm312_vm5, %v497_v29 }
 0x432   : > { %741 = vmatpush.bf16.msra.mxu3 %v1524_v16 }
 0x48e   : > { %v540_v27 = vpop.f32.mrf.mxu2 }
 0x48f   : > { %587 = vrot.lane.b32.xlu1 %v540_v27, %s1639_s18  ;;  %v582_v32 = vpop.f32.mrf.mxu0 }
 0x496   : > { %v542_v33 = vpop.f32.mrf.mxu2 }
 0x497   : > { %595 = vrot.lane.b32.xlu1 %v582_v32, %s1640_s19  ;;  %v584_v34 = vpop.f32.mrf.mxu0  ;;  %v1565_v33 = vld [vmem:[%s2003_s3 + $0x7] ss:$0 sm:$0xff] }
 0x4ac   : > { %v561_v35 = vpop.f32.mrf.mxu3 }
 0x4ad   : > { %591 = vrot.lane.b32.xlu2 %v561_v35, %s1641_s20 }
 0x4ae   : > { %v519_v36 = vpop.f32.mrf.mxu1 }
 0x4b4   : > { %v563_v37 = vpop.f32.mrf.mxu3 }
 0x4b6   : > { %v521_v31 = vpop.f32.mrf.mxu1 }
 0x501   : > { %v588_v40 = vpop.permute.xlu1 %587 }
 0x502   : > { %v598_v41 = vsel %vm312_vm5, %v519_v36, %v588_v40 }
 0x507   : > { %v592_v42 = vpop.permute.xlu2 %591 }
 0x508   : > { %v600_v43 = vsel %vm599_vm10, %v598_v41, %v592_v42 }
 0x509   : > { %v596_v44 = vpop.permute.xlu1 %595 }
 0x50a   : > { %v602_v45 = vsel %vm601_vm11, %v600_v43, %v596_v44  ;;  %v1529_v43 = vld [vmem:[%s2002_s2 + $0x18] sm:$0xff]  ;;  %v1528_v44 = vld [vmem:[%s2002_s2 + $0x10] sm:$0xff] }
 0x50b   : > { %v603_v46 = vpack.c.bf16 %v602_v45, %v602_v45  ;;  %820 = vmatpush.bf16.msrb.mxu0 %v1529_v43 }
 0x50d   : > { %1428 = vmatmul.msk.bf16.vlgmr.msra.gmra.mxu1 %vm212_vm0, %v603_v46 }
 0x50f   : > { %821 = vmatpush.bf16.msrb.mxu0 %v1528_v44 }
 0x58a   : > { %v630_v47 = vpop.f32.mrf.mxu1 }
 0x58b   : > { %v631_v49 = vadd.f32 %v1561_v48, %v630_v47 }
 0x58d   : > { %v634_v50 = vadd.f32 %v631_v49, %v1705_v30  ;;  %v1522_v30 = vld [vmem:[%s2002_s2 + $0x40] sm:$0xff] }
 0x58e   : > { %688 = vmatpush.bf16.msra.mxu2 %v1522_v30 }
 0x58f   : > { %v637_v51 = vsel %vm212_vm0, %v634_v50, 0.0 }
 0x590   : > { %638 = vadd.xlane.f32.xlu2 %v637_v51 }
 0x592   : > { %v632_v52 = vpop.f32.mrf.mxu1 }
 0x603   : > { %v639_v53 = vpop.xlane.xlu2 %638 }
 0x604   : > { %v640_v54 = vmul.f32 %v639_v53, %v1688_v8 }
 0x606   : > { %v641_v55 = vsub.f32 %v634_v50, %v640_v54  ;;  %v1566_v54 = vld [vmem:[%s2003_s3 + $0x8] ss:$0 sm:$0xff] }
 0x608   : > { %v642_v57 = vmul.f32 %v641_v55, %v641_v55 }
 0x60a   : > { %v643_v58 = vsel %vm212_vm0, %v642_v57, 0.0  ;;  %v1567_v57 = vld [vmem:[%s2003_s3 + $0x9] ss:$0 sm:$0xff] }
 0x60b   : > { %644 = vadd.xlane.f32.xlu1 %v643_v58 }
 0x67e   : > { %v645_v60 = vpop.xlane.xlu1 %644 }
 0x67f   : > { %v646_v61 = vmul.f32 %v645_v60, %v1688_v8 }
 0x681   : > { %v647_v62 = vadd.f32 1e-12, %v646_v61  ;;  %v1568_v61 = vld [vmem:[%s2003_s3 + $0xa] ss:$0 sm:$0xff] }
 0x683   : > { %1597 = vrsqrt.f32 %v647_v62  ;;  %vm654_vm13 = vweird.f32 %v647_v62 }
 0x689   : > { %v1598_v63 = vpop.eup %1597 }
 0x68a   : > { %v649_v0 = vmul.f32 %v1598_v63, %v647_v62  ;;  %vm655_vm12 = vweird.f32 %v1598_v63 }
 0x68b   : > { %vm656_vm14 = vmor %vm654_vm13, %vm655_vm12 }
 0x68c   : > { %v650_v1 = vmul.f32 %v1598_v63, %v649_v0 }
 0x68e   : > { %v651_v2 = vmul.f32 0.5, %v650_v1 }
 0x690   : > { %v652_v3 = vsub.f32 1.5, %v651_v2 }
 0x692   : > { %v653_v4 = vmul.f32 %v1598_v63, %v652_v3 }
 0x694   : > { %v657_v6 = vsel %vm656_vm14, %v1598_v63, %v653_v4 }
 0x695   : > { %v658_v9 = vmul.f32 %v657_v6, %v641_v55 }
 0x697   : > { %v660_v10 = vmul.f32 %v1562_v5, %v658_v9 }
 0x699   : > { %v662_v11 = vadd.f32 %v1563_v7, %v660_v10 }
 0x69b   : > { %v663_v12 = vpack.c.bf16 %v662_v11, %v662_v11 }
 0x69d   : > { %1437 = vmatmul.msk.bf16.vlgmr.msra.gmra.mxu2 %vm212_vm0, %v663_v12 }
 0x720   : > { %v690_v18 = vpop.f32.mrf.mxu2 }
 0x721   : > { %v691_v19 = vadd.f32 %v1564_v17, %v690_v18 }
 0x723   : > { %v695_v20 = vmul.f32 0.044715, %v691_v19  ;;  %v694_v28 = vmul.f32 0.5, %v691_v19 }
 0x725   : > { %v696_v21 = vmul.f32 %v695_v20, %v691_v19 }
 0x727   : > { %v697_v22 = vmul.f32 %v696_v21, %v691_v19 }
 0x728   : > { %v692_v23 = vpop.f32.mrf.mxu2 }
 0x729   : > { %v698_v24 = vadd.f32 %v697_v22, %v691_v19 }
 0x72b   : > { %v699_v25 = vmul.f32 0.7978846, %v698_v24 }
 0x72d   : > { %1599 = vtanh.f32 %v699_v25 }
 0x733   : > { %v1600_v26 = vpop.eup %1599 }
 0x734   : > { %v701_v29 = vadd.f32 1.0, %v1600_v26 }
 0x736   : > { %v702_v27 = vmul.f32 %v701_v29, %v694_v28 }
 0x738   : > { %v703_v32 = vpack.c.bf16 %v702_v27, %v702_v27 }
 0x73a   : > { %1454 = vmatmul.msk.bf16.vlgmr.msra.gmra.mxu3 %vm730_vm15, %v703_v32 }
 0x7bd   : > { %v743_v34 = vpop.f32.mrf.mxu3 }
 0x7be   : > { %v744_v35 = vadd.f32 %v1565_v33, %v743_v34 }
 0x7c0   : > { %v747_v36 = vadd.f32 %v744_v35, %v662_v11 }
 0x7c2   : > { %v750_v37 = vsel %vm212_vm0, %v747_v36, 0.0 }
 0x7c3   : > { %751 = vadd.xlane.f32.xlu0 %v750_v37 }
 0x7c5   : > { %v745_v31 = vpop.f32.mrf.mxu3 }
 0x836   : > { %v752_v38 = vpop.xlane.xlu0 %751 }
 0x837   : > { %v753_v39 = vmul.f32 %v752_v38, %v1688_v8 }
 0x839   : > { %v754_v40 = vsub.f32 %v747_v36, %v753_v39 }
 0x83b   : > { %v755_v41 = vmul.f32 %v754_v40, %v754_v40 }
 0x83d   : > { %v756_v42 = vsel %vm212_vm0, %v755_v41, 0.0 }
 0x83e   : > { %757 = vadd.xlane.f32.xlu0 %v756_v42 }
 0x8b1   : > { %v758_v45 = vpop.xlane.xlu0 %757 }
 0x8b2   : > { %v759_v46 = vmul.f32 %v758_v45, %v1688_v8 }
 0x8b4   : > { %v760_v48 = vadd.f32 1e-12, %v759_v46 }
 0x8b6   : > { %1601 = vrsqrt.f32 %v760_v48  ;;  %vm767_vm2 = vweird.f32 %v760_v48 }
 0x8bc   : > { %v1602_v47 = vpop.eup %1601 }
 0x8bd   : > { %v762_v49 = vmul.f32 %v1602_v47, %v760_v48  ;;  %vm768_vm1 = vweird.f32 %v1602_v47 }
 0x8be   : > { %vm769_vm3 = vmor %vm767_vm2, %vm768_vm1 }
 0x8bf   : > { %v763_v50 = vmul.f32 %v1602_v47, %v762_v49 }
 0x8c1   : > { %v764_v51 = vmul.f32 0.5, %v763_v50 }
 0x8c3   : > { %v765_v52 = vsub.f32 1.5, %v764_v51 }
 0x8c5   : > { %v766_v53 = vmul.f32 %v1602_v47, %v765_v52 }
 0x8c7   : > { %v770_v55 = vsel %vm769_vm3, %v1602_v47, %v766_v53 }
 0x8c8   : > { %v771_v58 = vmul.f32 %v770_v55, %v754_v40 }
 0x8ca   : > { %v773_v59 = vmul.f32 %v1566_v54, %v771_v58 }
 0x8cc   : > { %v1852_v30 = vadd.f32 %v1567_v57, %v773_v59 }
 0x8ce   : > { %v796_v60 = vpack.c.bf16 %v1852_v30, %v1852_v30 }
 0x8d0   : > { %1463 = vmatmul.msk.bf16.vlgmr.msrb.gmra.mxu0 %vm212_vm0, %v796_v60 }
 0x94d   : > { %v823_v62 = vpop.f32.mrf.mxu0 }
 0x94e   : > { %v824_v63 = vadd.f32 %v1568_v61, %v823_v62 }
 0x950   : > { %v827_v0 = vpack.c.bf16 %v824_v63, %v824_v63 }
 0x952   : > { %833 = vrot.lane.b32.xlu1 %v827_v0, %s1634_s8  ;;  %831 = vrot.lane.b32.xlu2 %v827_v0, %s1636_s10  ;;  %v835_v1 = vunpack.c.l.b16 %v827_v0 }
 0x953   : > { %829 = vrot.lane.b32.xlu0 %v827_v0, %s1635_s9 }
 0x954   : > { %v1863_v3 = vpack.c.b16 %v835_v1, %v835_v1 }
 0x955   : > { %v825_v2 = vpop.f32.mrf.mxu0 }
 0x95a   : > { %837 = vrot.lane.b32.xlu1 %v1863_v3, %s1637_s11 }
 0x9ac   : > { %v832_v11 = vpop.permute.xlu2 %831 }
 0x9ad   : > { %v881_v12 = vunpack.c.l.b16 %v832_v11 }
 0x9af   : > { %v882_v15 = vpack.c.b16 %v881_v12, %v881_v12 }
 0x9c4   : > { %v834_v4 = vpop.permute.xlu1 %833 }
 0x9c5   : > { %v904_v5 = vunpack.c.l.b16 %v834_v4  ;;  %v830_v6 = vpop.permute.xlu0 %829 }
 0x9c6   : > { %v858_v7 = vunpack.c.l.b16 %v830_v6 }
 0x9c7   : > { %v905_v9 = vpack.c.b16 %v904_v5, %v904_v5 }
 0x9c8   : > { %v1867_v10 = vpack.c.b16 %v858_v7, %v858_v7 }
 0x9c9   : > { %906 = vrot.lane.b32.xlu2 %v905_v9, %s1637_s11 }
 0x9ca   : > { %860 = vrot.lane.b32.xlu0 %v1867_v10, %s1637_s11 }
 0x9cc   : > { %v838_v13 = vpop.permute.xlu1 %837 }
 0x9cd   : > { %v843_v14 = vsel %vm312_vm5, %v838_v13, 0 }
 0x9ce   : > { %852 = vmatpush.bf16.xpose.msrb.mxu1 %v843_v14 }
 0x9d2   : > { %883 = vrot.lane.b32.xlu0 %v882_v15, %s1637_s11 }
 0x9d5   : > { %1464 = vmatmul.msk.bf16.vlgmr.msrb.gmra.mxu1 %vm312_vm5, %v827_v0 }
 0xa23   : > { %v907_v16 = vpop.permute.xlu2 %906 }
 0xa24   : > { %v912_v17 = vsel %vm312_vm5, %v907_v16, 0 }
 0xa25   : > { %921 = vmatpush.bf16.xpose.msra.mxu0 %v912_v17 }
 0xa2c   : > { %1467 = vmatmul.msk.bf16.vlgmr.msra.gmra.mxu0 %vm312_vm5, %v834_v4 }
 0xa3c   : > { %v861_v18 = vpop.permute.xlu0 %860 }
 0xa3d   : > { %v866_v19 = vsel %vm312_vm5, %v861_v18, 0 }
 0xa3e   : > { %875 = vmatpush.bf16.xpose.msrb.mxu2 %v866_v19 }
 0xa44   : > { %v884_v20 = vpop.permute.xlu0 %883 }
 0xa45   : > { %v889_v21 = vsel %vm312_vm5, %v884_v20, 0  ;;  %1465 = vmatmul.msk.bf16.vlgmr.msrb.gmra.mxu2 %vm312_vm5, %v830_v6 }
 0xa46   : > { %898 = vmatpush.bf16.xpose.msrb.mxu3 %v889_v21 }
 0xa4d   : > { %1466 = vmatmul.msk.bf16.vlgmr.msrb.gmra.mxu3 %vm312_vm5, %v832_v11 }
 0xa52   : > { %v854_v22 = vpop.f32.mrf.mxu1 }
 0xa53   : > { %v855_v33 = vadd.f32 %v1742_v56, %v854_v22 }
 0xa55   : > { %v927_v31 = vsel %vm312_vm5, %v855_v33, -inf }
 0xa5a   : > { %v856_v23 = vpop.f32.mrf.mxu1 }
 0xaa9   : > { %v923_v24 = vpop.f32.mrf.mxu0 }
 0xaaa   : > { %v924_v25 = vadd.f32 %v1742_v56, %v923_v24 }
 0xaac   : > { %v936_v26 = vsel %vm312_vm5, %v924_v25, -inf }
 0xaad   : > { %937 = vmax.xlane.f32.xlu1 %v936_v26 }
 0xab1   : > { %v925_v28 = vpop.f32.mrf.mxu0 }
 0xac8   : > { %v877_v29 = vpop.f32.mrf.mxu2 }
 0xac9   : > { %v878_v27 = vadd.f32 %v1742_v56, %v877_v29 }
 0xacb   : > { %v930_v32 = vsel %vm312_vm5, %v878_v27, -inf }
 0xacc   : > { %931 = vmax.xlane.f32.xlu0 %v930_v32 }
 0xad0   : > { %v879_v34 = vpop.f32.mrf.mxu2  ;;  %v900_v35 = vpop.f32.mrf.mxu3 }
 0xad1   : > { %v901_v36 = vadd.f32 %v1742_v56, %v900_v35 }
 0xad3   : > { %v933_v37 = vsel %vm312_vm5, %v901_v36, -inf }
 0xad4   : > { %934 = vmax.xlane.f32.xlu2 %v933_v37  ;;  %928 = vmax.xlane.f32.xlu0 %v927_v31 }
 0xad8   : > { %v902_v38 = vpop.f32.mrf.mxu3 }
 0xb20   : > { %v938_v39 = vpop.xlane.xlu1 %937 }
 0xb21   : > { %v942_v40 = vsub.f32 %v924_v25, %v938_v39 }
 0xb23   : > { %v949_v41 = vmul.f32 1.442695, %v942_v40 }
 0xb25   : > { %1603 = vpow2.f32 %v949_v41 }
 0xb2b   : > { %v1604_v42 = vpop.eup %1603 }
 0xb2c   : > { %v960_v43 = vsel %vm312_vm5, %v1604_v42, 0.0 }
 0xb2d   : > { %961 = vadd.xlane.f32.xlu0 %v960_v43 }
 0xb3f   : > { %v932_v44 = vpop.xlane.xlu0 %931 }
 0xb40   : > { %v940_v45 = vsub.f32 %v878_v27, %v932_v44 }
 0xb41   : > { %1090 = vrot.lane.b32.xlu0 %v905_v9, %s1638_s14 }
 0xb42   : > { %v945_v56 = vmul.f32 1.442695, %v940_v45 }
 0xb44   : > { %1605 = vpow2.f32 %v945_v56 }
 0xb47   : > { %v935_v46 = vpop.xlane.xlu2 %934  ;;  %v929_v53 = vpop.xlane.xlu0 %928 }
 0xb48   : > { %v941_v48 = vsub.f32 %v901_v36, %v935_v46  ;;  %v939_v54 = vsub.f32 %v855_v33, %v929_v53 }
 0xb49   : > { %1027 = vrot.lane.b32.xlu0 %v1863_v3, %s1638_s14 }
 0xb4a   : > { %v1893_v47 = vpop.eup %1605  ;;  %v947_v49 = vmul.f32 1.442695, %v941_v48  ;;  %v943_v55 = vmul.f32 1.442695, %v939_v54 }
 0xb4b   : > { %v954_v50 = vsel %vm312_vm5, %v1893_v47, 0.0 }
 0xb4c   : > { %1607 = vpow2.f32 %v947_v49  ;;  %955 = vadd.xlane.f32.xlu2 %v954_v50 }
 0xb4d   : > { %1609 = vpow2.f32 %v943_v55 }
 0xb52   : > { %v1897_v51 = vpop.eup %1607 }
 0xb53   : > { %v957_v52 = vsel %vm312_vm5, %v1897_v51, 0.0  ;;  %v1904_v57 = vpop.eup %1609 }
 0xb54   : > { %958 = vadd.xlane.f32.xlu1 %v957_v52  ;;  %v951_v58 = vsel %vm312_vm5, %v1904_v57, 0.0 }
 0xb64   : > { %1048 = vrot.lane.b32.xlu2 %v1867_v10, %s1638_s14 }
 0xb6d   : > { %1069 = vrot.lane.b32.xlu1 %v882_v15, %s1638_s14 }
 0xb8d   : > { %952 = vadd.xlane.f32.xlu2 %v951_v58 }
 0xba0   : > { %v962_v59 = vpop.xlane.xlu0 %961 }
 0xba1   : > { %1611 = vrcp.f32 %v962_v59  ;;  %v1016_v63 = vand.u32 2147483648, %v962_v59  ;;  %v1014_v1 = vand.u32 2147483647, %v962_v59  ;;  %vm1010_vm7 = vweird.f32 %v962_v59 }
 0xba3   : > { %v1017_v3 = vor.u32 1.1754944e-38, %v1016_v63  ;;  %vm1015_vm9 = vcmp.eq.f32.partialorder %v1014_v1, 8.507059e+37 }
 0xba7   : > { %v1612_v60 = vpop.eup %1611 }
 0xba8   : > { %v1006_v61 = vmul.f32 %v1612_v60, %v962_v59  ;;  %vm1011_vm4 = vweird.f32 %v1612_v60 }
 0xba9   : > { %vm1012_vm8 = vmor %vm1010_vm7, %vm1011_vm4 }
 0xbaa   : > { %v1007_v62 = vsub.f32 1.0, %v1006_v61 }
 0xbac   : > { %v1008_v0 = vmul.f32 %v1612_v60, %v1007_v62 }
 0xbae   : > { %v1009_v2 = vadd.f32 %v1612_v60, %v1008_v0 }
 0xbb0   : > { %v1013_v4 = vsel %vm1012_vm8, %v1612_v60, %v1009_v2  ;;  %v1530_v2 = vld [vmem:[%s2002_s2 + $0x30] sm:$0xff] }
 0xbb1   : > { %v1018_v5 = vsel %vm1015_vm9, %v1017_v3, %v1013_v4 }
 0xbb2   : > { %v1022_v6 = vmul.f32 %v1604_v42, %v1018_v5 }
 0xbb3   : > { %v1091_v7 = vpop.permute.xlu0 %1090 }
 0xbb4   : > { %v1096_v9 = vsel %vm506_vm6, %v1091_v7, 0  ;;  %v1026_v10 = vpack.c.bf16 %v1022_v6, %v1022_v6 }
 0xbb5   : > { %1105 = vmatpush.bf16.msrb.mxu0 %v1096_v9 }
 0xbb8   : > { %1471 = vmatmul.msk.bf16.vlgmr.msrb.gmra.mxu0 %vm312_vm5, %v1026_v10 }
 0xbbb   : > { %v1028_v11 = vpop.permute.xlu0 %1027 }
 0xbbc   : > { %v1033_v12 = vsel %vm506_vm6, %v1028_v11, 0  ;;  %v1569_v11 = vld [vmem:[%s2003_s3 + $0xb] ss:$0 sm:$0xff] }
 0xbbd   : > { %1042 = vmatpush.bf16.msra.mxu1 %v1033_v12 }
 0xbbf   : > { %v956_v13 = vpop.xlane.xlu2 %955 }
 0xbc0   : > { %1613 = vrcp.f32 %v956_v13  ;;  %v988_v20 = vand.u32 2147483648, %v956_v13  ;;  %v986_v22 = vand.u32 2147483647, %v956_v13  ;;  %vm982_vm13 = vweird.f32 %v956_v13 }
 0xbc2   : > { %v989_v25 = vor.u32 1.1754944e-38, %v988_v20  ;;  %vm987_vm1 = vcmp.eq.f32.partialorder %v986_v22, 8.507059e+37  ;;  %v1533_v22 = vld [vmem:[%s2002_s2 + $0x58] sm:$0xff] }
 0xbc6   : > { %v1614_v14 = vpop.eup %1613 }
 0xbc7   : > { %v978_v15 = vmul.f32 %v1614_v14, %v956_v13  ;;  %v1049_v16 = vpop.permute.xlu2 %1048  ;;  %v959_v17 = vpop.xlane.xlu1 %958  ;;  %vm983_vm12 = vweird.f32 %v1614_v14 }
 0xbc8   : > { %v1054_v18 = vsel %vm506_vm6, %v1049_v16, 0  ;;  %1615 = vrcp.f32 %v959_v17  ;;  %vm984_vm14 = vmor %vm982_vm13, %vm983_vm12  ;;  %v1002_v36 = vand.u32 2147483648, %v959_v17  ;;  %vm996_vm3 = vweird.f32 %v959_v17 }
 0xbc9   : > { %v979_v19 = vsub.f32 1.0, %v978_v15  ;;  %1063 = vmatpush.bf16.msra.mxu2 %v1054_v18  ;;  %v1000_v37 = vand.u32 2147483647, %v959_v17 }
 0xbca   : > { %v1003_v38 = vor.u32 1.1754944e-38, %v1002_v36  ;;  %v1571_v36 = vld [vmem:[%s2003_s3 + $0xd] ss:$0 sm:$0xff] }
 0xbcb   : > { %v980_v21 = vmul.f32 %v1614_v14, %v979_v19  ;;  %vm1001_vm7 = vcmp.eq.f32.partialorder %v1000_v37, 8.507059e+37 }
 0xbcd   : > { %v981_v23 = vadd.f32 %v1614_v14, %v980_v21  ;;  %1210 = vmatpush.bf16.msrb.mxu2 %v1533_v22 }
 0xbce   : > { %v1616_v24 = vpop.eup %1615 }
 0xbcf   : > { %v985_v26 = vsel %vm984_vm14, %v1614_v14, %v981_v23  ;;  %v992_v28 = vmul.f32 %v1616_v24, %v959_v17  ;;  %vm997_vm2 = vweird.f32 %v1616_v24 }
 0xbd0   : > { %v990_v29 = vsel %vm987_vm1, %v989_v25, %v985_v26  ;;  %vm998_vm4 = vmor %vm996_vm3, %vm997_vm2 }
 0xbd1   : > { %v1020_v27 = vmul.f32 %v1893_v47, %v990_v29  ;;  %v993_v32 = vsub.f32 1.0, %v992_v28 }
 0xbd3   : > { %v994_v33 = vmul.f32 %v1616_v24, %v993_v32  ;;  %v1024_v34 = vpack.c.bf16 %v1020_v27, %v1020_v27 }
 0xbd5   : > { %v995_v35 = vadd.f32 %v1616_v24, %v994_v33  ;;  %1469 = vmatmul.msk.bf16.vlgmr.msra.gmra.mxu2 %vm312_vm5, %v1024_v34  ;;  %v1570_v34 = vld [vmem:[%s2003_s3 + $0xc] ss:$0 sm:$0xff] }
 0xbd7   : > { %v999_v31 = vsel %vm998_vm4, %v1616_v24, %v995_v35 }
 0xbd8   : > { %v1004_v39 = vsel %vm1001_vm7, %v1003_v38, %v999_v31 }
 0xbd9   : > { %v1021_v40 = vmul.f32 %v1897_v51, %v1004_v39 }
 0xbdb   : > { %v1025_v43 = vpack.c.bf16 %v1021_v40, %v1021_v40  ;;  %v1537_v40 = vld [vmem:[%s2002_s2 + $0x98] sm:$0xff] }
 0xbdf   : > { %v1070_v41 = vpop.permute.xlu1 %1069 }
 0xbe0   : > { %v1075_v42 = vsel %vm506_vm6, %v1070_v41, 0  ;;  %v1536_v41 = vld [vmem:[%s2002_s2 + $0x90] sm:$0xff] }
 0xbe1   : > { %1084 = vmatpush.bf16.msra.mxu3 %v1075_v42  ;;  %v1535_v42 = vld [vmem:[%s2002_s2 + $0x88] sm:$0xff] }
 0xbe4   : > { %1470 = vmatmul.msk.bf16.vlgmr.msra.gmra.mxu3 %vm312_vm5, %v1025_v43  ;;  %v1534_v43 = vld [vmem:[%s2002_s2 + $0x80] sm:$0xff] }
 0xbe5   : > { %1260 = vmatpush.bf16.msrb.mxu3 %v1537_v40 }
 0xbe9   : > { %1261 = vmatpush.bf16.msrb.mxu3 %v1536_v41 }
 0xbed   : > { %1262 = vmatpush.bf16.msrb.mxu3 %v1535_v42 }
 0xbf1   : > { %1263 = vmatpush.bf16.msrb.mxu3 %v1534_v43 }
 0xc00   : > { %v953_v44 = vpop.xlane.xlu2 %952 }
 0xc01   : > { %1617 = vrcp.f32 %v953_v44  ;;  %v974_v48 = vand.u32 2147483648, %v953_v44  ;;  %v972_v49 = vand.u32 2147483647, %v953_v44  ;;  %vm968_vm9 = vweird.f32 %v953_v44 }
 0xc03   : > { %v975_v51 = vor.u32 1.1754944e-38, %v974_v48  ;;  %vm973_vm13 = vcmp.eq.f32.partialorder %v972_v49, 8.507059e+37 }
 0xc07   : > { %v1618_v45 = vpop.eup %1617 }
 0xc08   : > { %v964_v56 = vmul.f32 %v1618_v45, %v953_v44  ;;  %vm969_vm8 = vweird.f32 %v1618_v45  ;;  %v1572_v44 = vld [vmem:[%s2003_s3 + $0xe] ss:$0 sm:$0xff] }
 0xc09   : > { %vm970_vm12 = vmor %vm968_vm9, %vm969_vm8 }
 0xc0a   : > { %v965_v46 = vsub.f32 1.0, %v964_v56 }
 0xc0c   : > { %v966_v47 = vmul.f32 %v1618_v45, %v965_v46 }
 0xc0e   : > { %v967_v50 = vadd.f32 %v1618_v45, %v966_v47 }
 0xc10   : > { %v971_v52 = vsel %vm970_vm12, %v1618_v45, %v967_v50 }
 0xc11   : > { %v976_v53 = vsel %vm973_vm13, %v975_v51, %v971_v52 }
 0xc12   : > { %v1019_v54 = vmul.f32 %v1904_v57, %v976_v53  ;;  %v1531_v57 = vld [vmem:[%s2002_s2 + $0x38] sm:$0xff] }
 0xc13   : > { %1150 = vmatpush.bf16.msrb.mxu1 %v1531_v57 }
 0xc14   : > { %v1023_v55 = vpack.c.bf16 %v1019_v54, %v1019_v54 }
 0xc16   : > { %1468 = vmatmul.msk.bf16.vlgmr.msra.gmra.mxu1 %vm312_vm5, %v1023_v55 }
 0xc17   : > { %1151 = vmatpush.bf16.msrb.mxu1 %v1530_v2 }
 0xc35   : > { %v1107_v58 = vpop.f32.mrf.mxu0 }
 0xc3d   : > { %v1109_v59 = vpop.f32.mrf.mxu0 }
 0xc3e   : > { %v1573_v59 = vld [vmem:[%s2003_s3 + $0xf] ss:$0 sm:$0xff] }
 0xc58   : > { %v1065_v60 = vpop.f32.mrf.mxu2 }
 0xc59   : > { %1112 = vrot.lane.b32.xlu1 %v1065_v60, %s1639_s18 }
 0xc60   : > { %v1067_v61 = vpop.f32.mrf.mxu2 }
 0xc61   : > { %1120 = vrot.lane.b32.xlu1 %v1107_v58, %s1640_s19 }
 0xc67   : > { %v1086_v62 = vpop.f32.mrf.mxu3 }
 0xc68   : > { %1116 = vrot.lane.b32.xlu0 %v1086_v62, %s1641_s20 }
 0xc6f   : > { %v1088_v63 = vpop.f32.mrf.mxu3 }
 0xc93   : > { %v1044_v0 = vpop.f32.mrf.mxu1 }
 0xc9b   : > { %v1046_v1 = vpop.f32.mrf.mxu1 }
 0xccb   : > { %v1113_v3 = vpop.permute.xlu1 %1112 }
 0xccc   : > { %v1123_v4 = vsel %vm312_vm5, %v1044_v0, %v1113_v3 }
 0xcd3   : > { %v1121_v6 = vpop.permute.xlu1 %1120 }
 0xcda   : > { %v1117_v5 = vpop.permute.xlu0 %1116 }
 0xcdb   : > { %v1124_v7 = vsel %vm599_vm10, %v1123_v4, %v1117_v5  ;;  %v1539_v5 = vld [vmem:[%s2002_s2 + $0xa8] sm:$0xff] }
 0xcdc   : > { %v1125_v9 = vsel %vm601_vm11, %v1124_v7, %v1121_v6  ;;  %1326 = vmatpush.bf16.msra.mxu0 %v1539_v5  ;;  %v1538_v6 = vld [vmem:[%s2002_s2 + $0xa0] sm:$0xff] }
 0xcdd   : > { %v1126_v10 = vpack.c.bf16 %v1125_v9, %v1125_v9 }
 0xcdf   : > { %1480 = vmatmul.msk.bf16.vlgmr.msrb.gmra.mxu1 %vm212_vm0, %v1126_v10 }
 0xce0   : > { %1327 = vmatpush.bf16.msra.mxu0 %v1538_v6 }
 0xd5c   : > { %v1153_v12 = vpop.f32.mrf.mxu1 }
 0xd5d   : > { %v1154_v13 = vadd.f32 %v1569_v11, %v1153_v12 }
 0xd5f   : > { %v1157_v14 = vadd.f32 %v1154_v13, %v1852_v30  ;;  %v1532_v30 = vld [vmem:[%s2002_s2 + $0x50] sm:$0xff] }
 0xd60   : > { %1211 = vmatpush.bf16.msrb.mxu2 %v1532_v30  ;;  %v1576_v30 = vld [vmem:[%s2003_s3 + $0x12] ss:$0 sm:$0xff] }
 0xd61   : > { %v1160_v15 = vsel %vm212_vm0, %v1157_v14, 0.0 }
 0xd62   : > { %1161 = vadd.xlane.f32.xlu0 %v1160_v15 }
 0xd64   : > { %v1155_v16 = vpop.f32.mrf.mxu1 }
 0xdd5   : > { %v1162_v17 = vpop.xlane.xlu0 %1161 }
 0xdd6   : > { %v1163_v18 = vmul.f32 %v1162_v17, %v1688_v8  ;;  %v1574_v17 = vld [vmem:[%s2003_s3 + $0x10] ss:$0 sm:$0xff] }
 0xdd8   : > { %v1164_v19 = vsub.f32 %v1157_v14, %v1163_v18 }
 0xdda   : > { %v1165_v20 = vmul.f32 %v1164_v19, %v1164_v19 }
 0xddc   : > { %v1166_v21 = vsel %vm212_vm0, %v1165_v20, 0.0 }
 0xddd   : > { %1167 = vadd.xlane.f32.xlu1 %v1166_v21 }
 0xe50   : > { %v1168_v23 = vpop.xlane.xlu1 %1167 }
 0xe51   : > { %v1169_v24 = vmul.f32 %v1168_v23, %v1688_v8 }
 0xe53   : > { %v1170_v25 = vadd.f32 1e-12, %v1169_v24 }
 0xe55   : > { %1619 = vrsqrt.f32 %v1170_v25  ;;  %vm1177_vm6 = vweird.f32 %v1170_v25 }
 0xe5b   : > { %v1620_v26 = vpop.eup %1619 }
 0xe5c   : > { %v1172_v28 = vmul.f32 %v1620_v26, %v1170_v25  ;;  %vm1178_vm5 = vweird.f32 %v1620_v26 }
 0xe5d   : > { %vm1179_vm10 = vmor %vm1177_vm6, %vm1178_vm5 }
 0xe5e   : > { %v1173_v29 = vmul.f32 %v1620_v26, %v1172_v28 }
 0xe60   : > { %v1174_v27 = vmul.f32 0.5, %v1173_v29 }
 0xe62   : > { %v1175_v32 = vsub.f32 1.5, %v1174_v27 }
 0xe64   : > { %v1176_v33 = vmul.f32 %v1620_v26, %v1175_v32 }
 0xe66   : > { %v1180_v35 = vsel %vm1179_vm10, %v1620_v26, %v1176_v33 }
 0xe67   : > { %v1181_v37 = vmul.f32 %v1180_v35, %v1164_v19 }
 0xe69   : > { %v1183_v31 = vmul.f32 %v1570_v34, %v1181_v37 }
 0xe6b   : > { %v1185_v38 = vadd.f32 %v1571_v36, %v1183_v31 }
 0xe6d   : > { %v1186_v39 = vpack.c.bf16 %v1185_v38, %v1185_v38 }
 0xe6f   : > { %1489 = vmatmul.msk.bf16.vlgmr.msrb.gmra.mxu2 %vm212_vm0, %v1186_v39 }
 0xef2   : > { %v1213_v45 = vpop.f32.mrf.mxu2 }
 0xef3   : > { %v1214_v56 = vadd.f32 %v1572_v44, %v1213_v45 }
 0xef5   : > { %v1218_v46 = vmul.f32 0.044715, %v1214_v56  ;;  %v1217_v53 = vmul.f32 0.5, %v1214_v56 }
 0xef7   : > { %v1219_v48 = vmul.f32 %v1218_v46, %v1214_v56 }
 0xef9   : > { %v1220_v47 = vmul.f32 %v1219_v48, %v1214_v56 }
 0xefa   : > { %v1215_v49 = vpop.f32.mrf.mxu2 }
 0xefb   : > { %v1221_v50 = vadd.f32 %v1220_v47, %v1214_v56 }
 0xefd   : > { %v1222_v51 = vmul.f32 0.7978846, %v1221_v50 }
 0xeff   : > { %1621 = vtanh.f32 %v1222_v51 }
 0xf05   : > { %v1622_v52 = vpop.eup %1621 }
 0xf06   : > { %v1224_v54 = vadd.f32 1.0, %v1622_v52 }
 0xf08   : > { %v1225_v55 = vmul.f32 %v1224_v54, %v1217_v53 }
 0xf0a   : > { %v1226_v58 = vpack.c.bf16 %v1225_v55, %v1225_v55 }
 0xf0c   : > { %1506 = vmatmul.msk.bf16.vlgmr.msrb.gmra.mxu3 %vm730_vm15, %v1226_v58 }
 0xf8f   : > { %v1265_v60 = vpop.f32.mrf.mxu3 }
 0xf90   : > { %v1266_v61 = vadd.f32 %v1573_v59, %v1265_v60 }
 0xf92   : > { %v1269_v62 = vadd.f32 %v1266_v61, %v1185_v38 }
 0xf94   : > { %v1272_v63 = vsel %vm212_vm0, %v1269_v62, 0.0 }
 0xf95   : > { %1273 = vadd.xlane.f32.xlu2 %v1272_v63 }
 0xf97   : > { %v1267_v0 = vpop.f32.mrf.mxu3 }
0x1008   : > { %v1274_v1 = vpop.xlane.xlu2 %1273 }
0x1009   : > { %v1275_v57 = vmul.f32 %v1274_v1, %v1688_v8 }
0x100b   : > { %v1276_v2 = vsub.f32 %v1269_v62, %v1275_v57 }
0x100d   : > { %v1277_v3 = vmul.f32 %v1276_v2, %v1276_v2 }
0x100f   : > { %v1278_v4 = vsel %vm212_vm0, %v1277_v3, 0.0 }
0x1010   : > { %1279 = vadd.xlane.f32.xlu2 %v1278_v4 }
0x1083   : > { %v1280_v7 = vpop.xlane.xlu2 %1279 }
0x1084   : > { %v1281_v9 = vmul.f32 %v1280_v7, %v1688_v8  ;;  %v1575_v8 = vld [vmem:[%s2003_s3 + $0x11] ss:$0 sm:$0xff] }
0x1086   : > { %v1282_v10 = vadd.f32 1e-12, %v1281_v9 }
0x1088   : > { %1623 = vrsqrt.f32 %v1282_v10  ;;  %vm1289_vm15 = vweird.f32 %v1282_v10 }
0x108e   : > { %v1624_v11 = vpop.eup %1623 }
0x108f   : > { %v1284_v12 = vmul.f32 %v1624_v11, %v1282_v10  ;;  %vm1290_vm11 = vweird.f32 %v1624_v11 }
0x1090   : > { %vm1291_vm14 = vmor %vm1289_vm15, %vm1290_vm11 }
0x1091   : > { %v1285_v13 = vmul.f32 %v1624_v11, %v1284_v12 }
0x1093   : > { %v1286_v14 = vmul.f32 0.5, %v1285_v13 }
0x1095   : > { %v1287_v15 = vsub.f32 1.5, %v1286_v14 }
0x1097   : > { %v1288_v16 = vmul.f32 %v1624_v11, %v1287_v15 }
0x1099   : > { %v1292_v18 = vsel %vm1291_vm14, %v1624_v11, %v1288_v16 }
0x109a   : > { %v1293_v19 = vmul.f32 %v1292_v18, %v1276_v2 }
0x109c   : > { %v1295_v20 = vmul.f32 %v1574_v17, %v1293_v19 }
0x109e   : > { %v1297_v21 = vadd.f32 %v1575_v8, %v1295_v20 }
0x10a0   : > { %v1302_v22 = vpack.c.bf16 %v1297_v21, %v1297_v21 }
0x10a2   : > { %1515 = vmatmul.msk.bf16.vlgmr.msra.gmra.mxu0 %vm212_vm0, %v1302_v22 }
0x111f   : > { %v1329_v23 = vpop.f32.mrf.mxu0 }
0x1120   : > { %v1330_v24 = vadd.f32 %v1576_v30, %v1329_v23 }
0x1122   : > { %1333 = vst [vmem:[%s206_s12] sm:$0xff] %v1330_v24 }
0x1127   : > { %v1331_v25 = vpop.f32.mrf.mxu0 }
0x1128 PF: > { %s14_s15 = sadd.s32 1, %s1631_s15  }
0x1129   : > { %p11_p4 = scmp.ge.s32.totalorder %s14_s15, 4  }
0x112b   :  { %13 = sbr.rel (!%p11_p4) target bundleno = 1 (0x1), region = 69 }

</bundles_post_ra>
